<compile_context>
chip_gen: v6e
topology: v6e:2x2x1
jax: 0.10.0
libtpu: 0.0.40
codegen_flags: <defaults>
</compile_context>

<pallas_src>
import numpy as np
import jax
import jax.numpy as jnp
from jax.experimental import pallas as pl
from jax.experimental.pallas import tpu as pltpu

EPS = 1e-5
LANE = 128
STRIDE = 2


# ---------------------------------------------------------------------------
# Fused kernel.  Activation layout: 2-D matrices with
#   rows = (n, h)  [batch major, height minor],  cols = (w, c)  [width major,
#   channel minor].  Everything stays resident in VMEM/vregs.
# ---------------------------------------------------------------------------
def _fused_encoder_kernel(xp_ref, row0_ref, col0_ref, bias0_ref, gamma_ref,
                          beta_ref, bn_ref, row1_ref, col1_ref, bias1_ref,
                          o_ref):
    f32 = jnp.float32

    def conv_taps(act, r_ref, c_ref):
        # stride-2 KxK conv as sum over taps of (row-gather) @ (weight placement)
        out = jnp.dot(jnp.dot(r_ref[0], act, preferred_element_type=f32),
                      c_ref[0], preferred_element_type=f32)
        for t in range(1, r_ref.shape[0]):
            gath = jnp.dot(r_ref[t], act, preferred_element_type=f32)
            out = out + jnp.dot(gath, c_ref[t], preferred_element_type=f32)
        return out

    # ---- layer 0: Conv2d(C0 -> C1, 3, stride=2) + bias + ReLU ----
    z = jnp.maximum(conv_taps(xp_ref[...], row0_ref, col0_ref) + bias0_ref[...],
                    0.0)                                   # (N*Ho, Wo*C1)

    # ---- BatchNorm2d(C1): training-mode batch stats, biased var, eps=1e-5 ----
    # bn_ref is a (cols x cols) per-channel averaging map pre-scaled by
    # 1/(N*Ho*Wo): channel reduce + broadcast in one MXU matmul each.
    bn_map = bn_ref[...]
    mean_cols = jnp.dot(jnp.sum(z, axis=0, keepdims=True), bn_map,
                        preferred_element_type=f32)
    d = z - mean_cols
    var_cols = jnp.dot(jnp.sum(d * d, axis=0, keepdims=True), bn_map,
                       preferred_element_type=f32)
    y0n = d * (gamma_ref[...] * jax.lax.rsqrt(var_cols + EPS)) + beta_ref[...]

    # ---- layer 1: Conv2d(C1 -> 4*C2, 3, stride=2) + bias ----
    # Output columns are (wo2, c2) with c2 zero-padded to 128 -> lane-dense store.
    o_ref[...] = conv_taps(y0n, row1_ref, col1_ref) + bias1_ref[...]


# ---------------------------------------------------------------------------
# Host-side packing of the conv/BN parameters into the kernel's operand layout
# (done once; analogous to weight.reshape(C_out, -1).T preprocessing).
# ---------------------------------------------------------------------------
def _make_row_select(batch, h_in, h_out, kh, kw, stride):
    r = np.zeros((kh * kw, batch * h_out, batch * h_in), np.float32)
    for t in range(kh * kw):
        dh = t // kw
        for b in range(batch):
            for ho in range(h_out):
                r[t, b * h_out + ho, b * h_in + stride * ho + dh] = 1.0
    return r


def _make_col_map(w_np, w_in, w_out, stride, c_out_pad):
    # w_np: (C_out, C_in, kh, kw) -> cm[t, wi*C_in + ci, wo*c_out_pad + co]
    c_out, c_in, kh, kw = w_np.shape
    cm = np.zeros((kh * kw, w_in * c_in, w_out * c_out_pad), np.float32)
    for t in range(kh * kw):
        dh, dw = divmod(t, kw)
        for wo in range(w_out):
            wi = stride * wo + dw
            cm[t, wi * c_in:(wi + 1) * c_in,
               wo * c_out_pad:wo * c_out_pad + c_out] = w_np[:, :, dh, dw].T
    return cm


def _make_channel_map(w_out, c):
    mc = np.zeros((w_out * c, c), np.float32)
    for wo in range(w_out):
        for ci in range(c):
            mc[wo * c + ci, ci] = 1.0
    return mc


def pack_params(params, channels, kernels, in_hw, batch):
    assert len(kernels) == 2, "fused kernel covers the 2-layer encoder config"
    # TODO(synk): generalize packing/kernel to arbitrary layer counts.
    h, w = in_hw
    ch0, ch1 = channels[0], channels[1]
    ch_out = 4 * channels[2]
    k0, k1 = kernels
    ho = (h - k0) // STRIDE + 1
    wo = (w - k0) // STRIDE + 1
    ho2 = (ho - k1) // STRIDE + 1
    wo2 = (wo - k1) // STRIDE + 1
    c_out_pad = ((ch_out + LANE - 1) // LANE) * LANE

    w0 = np.asarray(params["conv0_w"], np.float32)
    b0 = np.asarray(params["conv0_b"], np.float32)
    w1 = np.asarray(params["conv1_w"], np.float32)
    b1 = np.asarray(params["conv1_b"], np.float32)
    gamma = np.asarray(params["bn0_gamma"], np.float32)
    beta = np.asarray(params["bn0_beta"], np.float32)

    mc = _make_channel_map(wo, ch1)                          # (Wo*C1, C1)
    bn_map = (mc @ mc.T) / float(batch * ho * wo)            # (Wo*C1, Wo*C1)

    b1_cols = np.zeros((1, wo2 * c_out_pad), np.float32)
    for j in range(wo2):
        b1_cols[0, j * c_out_pad:j * c_out_pad + ch_out] = b1

    packed = {
        "row0": jnp.asarray(_make_row_select(batch, h, ho, k0, k0, STRIDE)),
        "col0": jnp.asarray(_make_col_map(w0, w, wo, STRIDE, ch1)),
        "bias0": jnp.asarray(np.tile(b0, wo).reshape(1, -1)),
        "gamma": jnp.asarray(np.tile(gamma, wo).reshape(1, -1)),
        "beta": jnp.asarray(np.tile(beta, wo).reshape(1, -1)),
        "bn_map": jnp.asarray(bn_map),
        "row1": jnp.asarray(_make_row_select(batch, ho, ho2, k1, k1, STRIDE)),
        "col1": jnp.asarray(_make_col_map(w1, wo, wo2, STRIDE, c_out_pad)),
        "bias1": jnp.asarray(b1_cols),
        "meta": {"in_chw": (ch0, h, w), "batch": batch, "ho": ho, "wo": wo,
                 "ho2": ho2, "wo2": wo2, "c_out": ch_out, "c_out_pad": c_out_pad},
    }
    return packed


# ---------------------------------------------------------------------------
# pallas_call wrapper (whole problem fits a single VMEM block at these sizes)
# ---------------------------------------------------------------------------
def _full_spec(shape):
    zeros = (0,) * len(shape)
    return pl.BlockSpec(shape, lambda i, z=zeros: z)


def _fused_call(xp, packed):
    ops = [xp, packed["row0"], packed["col0"], packed["bias0"], packed["gamma"],
           packed["beta"], packed["bn_map"], packed["row1"], packed["col1"],
           packed["bias1"]]
    out_rows = packed["row1"].shape[1]                       # N * Ho2
    out_cols = packed["col1"].shape[2]                       # Wo2 * C_out_pad
    return pl.pallas_call(
        _fused_encoder_kernel,
        out_shape=jax.ShapeDtypeStruct((out_rows, out_cols), jnp.float32),
        grid=(1,),
        in_specs=[_full_spec(op.shape) for op in ops],
        out_specs=_full_spec((out_rows, out_cols)),
        compiler_params=pltpu.CompilerParams(dimension_semantics=("arbitrary",)),
    )(*ops)


def s_encdec_forward(x, packed):
    meta = packed["meta"]
    lead = x.shape[:-3]
    c, h, w = x.shape[-3:]
    n = 1
    for d in lead:
        n *= d
    assert (c, h, w) == meta["in_chw"] and n == meta["batch"]

    # inputs.view(-1, C, H, W), then NCHW -> rows (n,h) x cols (w,c)
    xp = x.reshape((n, c, h, w)).transpose(0, 2, 3, 1).reshape(n * h, w * c)

    out_pad = _fused_call(xp, packed)                        # (N*Ho2, Wo2*C_out_pad)

    ho2, wo2 = meta["ho2"], meta["wo2"]
    c_out, c_out_pad = meta["c_out"], meta["c_out_pad"]
    y = out_pad.reshape(n, ho2, wo2, c_out_pad)[..., :c_out].transpose(0, 3, 1, 2)
    # outputs.view(*inputs_size[:-3], *outputs.size()[-3:])
    return y.reshape(lead + (c_out, ho2, wo2))


# ---------------------------------------------------------------------------
# Deterministic parameter init (shapes from S_EncDec.__init__, encoder=True)
# ---------------------------------------------------------------------------
def init_params(key, channels, kernels):
    params = {}
    n_layers = len(kernels)
    for i in range(n_layers):
        c_in = channels[i]
        c_out = channels[i + 1] if i < n_layers - 1 else 4 * channels[i + 1]
        k = kernels[i]
        key, kw_key, kb_key = jax.random.split(key, 3)
        params[f"conv{i}_w"] = 0.1 * jax.random.normal(
            kw_key, (c_out, c_in, k, k), jnp.float32)
        params[f"conv{i}_b"] = 0.1 * jax.random.normal(
            kb_key, (c_out,), jnp.float32)
        if i < n_layers - 1:
            params[f"bn{i}_gamma"] = jnp.ones((channels[i + 1],), jnp.float32)
            params[f"bn{i}_beta"] = jnp.zeros((channels[i + 1],), jnp.float32)
    return params


# ---------------------------------------------------------------------------
# Pure-JAX reference (mirrors the PyTorch module) for a correctness gate.
# ---------------------------------------------------------------------------
def reference_forward(x, params):
    lead = x.shape[:-3]
    c, h, w = x.shape[-3:]
    dn = ("NCHW", "OIHW", "NCHW")
    hp = jax.lax.Precision.HIGHEST
    y = x.reshape((-1, c, h, w))
    y = jax.lax.conv_general_dilated(y, params["conv0_w"], (2, 2), "VALID",
                                     dimension_numbers=dn, precision=hp)
    y = jnp.maximum(y + params["conv0_b"][None, :, None, None], 0.0)
    mean = jnp.mean(y, axis=(0, 2, 3), keepdims=True)
    var = jnp.mean(jnp.square(y - mean), axis=(0, 2, 3), keepdims=True)
    y = (params["bn0_gamma"][None, :, None, None] * (y - mean)
         * jax.lax.rsqrt(var + EPS) + params["bn0_beta"][None, :, None, None])
    y = jax.lax.conv_general_dilated(y, params["conv1_w"], (2, 2), "VALID",
                                     dimension_numbers=dn, precision=hp)
    y = y + params["conv1_b"][None, :, None, None]
    return y.reshape(lead + y.shape[-3:])


if __name__ == "__main__":
    channels = [4, 8, 16]
    kernels = [3, 3]

    key = jax.random.PRNGKey(0)
    key, xkey = jax.random.split(key)
    params = init_params(key, channels, kernels)

    # 5-D input (batch=2, seq=2, C=4, H=W=16) to exercise the view()/reshape path
    x = jax.random.normal(xkey, (2, 2, 4, 16, 16), jnp.float32)
    batch = 1
    for d in x.shape[:-3]:
        batch *= d

    packed = pack_params(params, channels, kernels, x.shape[-2:], batch)

    out = s_encdec_forward(x, packed)
    out = jax.block_until_ready(out)

    # expected: conv stride 2, k=3: 16 -> 7 -> 3; last conv has 4*16 = 64 channels
    assert out.shape == (2, 2, 64, 3, 3), out.shape
    assert bool(jnp.all(jnp.isfinite(out)))

    ref = reference_forward(x, params)
    err = float(jnp.max(jnp.abs(out - ref)))
    assert err < 5e-2, f"max abs err vs reference = {err}"

    print("KERNEL_OK")
</pallas_src>

<mosaic_0001>
module attributes {stable_mosaic.version = 11 : i64} {
  func.func @_fused_encoder_kernel(%arg0: i32, %arg1: memref<64x64xf32, #tpu.memory_space<vmem>>, %arg2: memref<9x28x64xf32, #tpu.memory_space<vmem>>, %arg3: memref<9x64x56xf32, #tpu.memory_space<vmem>>, %arg4: memref<1x56xf32, #tpu.memory_space<vmem>>, %arg5: memref<1x56xf32, #tpu.memory_space<vmem>>, %arg6: memref<1x56xf32, #tpu.memory_space<vmem>>, %arg7: memref<56x56xf32, #tpu.memory_space<vmem>>, %arg8: memref<9x12x28xf32, #tpu.memory_space<vmem>>, %arg9: memref<9x56x384xf32, #tpu.memory_space<vmem>>, %arg10: memref<1x384xf32, #tpu.memory_space<vmem>>, %arg11: memref<12x384xf32, #tpu.memory_space<vmem>>) attributes {dimension_semantics = [#tpu.dimension_semantics<arbitrary>], iteration_bounds = array<i64: 1>, scalar_prefetch = 0 : i64, scratch_operands = 0 : i64, tpu.core_type = #tpu.core_type<tc>, window_params = [{pipeline_mode = #tpu.pipeline_mode<synchronous>, transform_indices = @transform_0, window_bounds = array<i64: 64, 64>}, {pipeline_mode = #tpu.pipeline_mode<synchronous>, transform_indices = @transform_1, window_bounds = array<i64: 9, 28, 64>}, {pipeline_mode = #tpu.pipeline_mode<synchronous>, transform_indices = @transform_2, window_bounds = array<i64: 9, 64, 56>}, {pipeline_mode = #tpu.pipeline_mode<synchronous>, transform_indices = @transform_3, window_bounds = array<i64: 1, 56>}, {pipeline_mode = #tpu.pipeline_mode<synchronous>, transform_indices = @transform_4, window_bounds = array<i64: 1, 56>}, {pipeline_mode = #tpu.pipeline_mode<synchronous>, transform_indices = @transform_5, window_bounds = array<i64: 1, 56>}, {pipeline_mode = #tpu.pipeline_mode<synchronous>, transform_indices = @transform_6, window_bounds = array<i64: 56, 56>}, {pipeline_mode = #tpu.pipeline_mode<synchronous>, transform_indices = @transform_7, window_bounds = array<i64: 9, 12, 28>}, {pipeline_mode = #tpu.pipeline_mode<synchronous>, transform_indices = @transform_8, window_bounds = array<i64: 9, 56, 384>}, {pipeline_mode = #tpu.pipeline_mode<synchronous>, transform_indices = @transform_9, window_bounds = array<i64: 1, 384>}, {pipeline_mode = #tpu.pipeline_mode<synchronous>, transform_indices = @transform_10, window_bounds = array<i64: 12, 384>}]} {
    %c0 = arith.constant 0 : index
    %c0_0 = arith.constant 0 : index
    %0 = vector.load %arg1[%c0, %c0_0] : memref<64x64xf32, #tpu.memory_space<vmem>>, vector<64x64xf32>
    %c0_1 = arith.constant 0 : index
    %c0_2 = arith.constant 0 : index
    %c0_3 = arith.constant 0 : index
    %1 = vector.load %arg2[%c0_1, %c0_2, %c0_3] : memref<9x28x64xf32, #tpu.memory_space<vmem>>, vector<1x28x64xf32>
    %2 = vector.shape_cast %1 : vector<1x28x64xf32> to vector<28x64xf32>
    %cst = arith.constant dense<0.000000e+00> : vector<28x64xf32>
    %3 = tpu.matmul %2, %0, %cst {dimension_numbers = #tpu.dot_dimension_numbers<[1], [0], [0], [1], [0, 0, 1, 1], [], []>} : vector<28x64xf32>, vector<64x64xf32>, vector<28x64xf32> -> vector<28x64xf32>
    %c0_4 = arith.constant 0 : index
    %c0_5 = arith.constant 0 : index
    %c0_6 = arith.constant 0 : index
    %4 = vector.load %arg3[%c0_4, %c0_5, %c0_6] : memref<9x64x56xf32, #tpu.memory_space<vmem>>, vector<1x64x56xf32>
    %5 = vector.shape_cast %4 : vector<1x64x56xf32> to vector<64x56xf32>
    %cst_7 = arith.constant dense<0.000000e+00> : vector<28x56xf32>
    %6 = tpu.matmul %3, %5, %cst_7 {dimension_numbers = #tpu.dot_dimension_numbers<[1], [0], [0], [1], [0, 0, 1, 1], [], []>} : vector<28x64xf32>, vector<64x56xf32>, vector<28x56xf32> -> vector<28x56xf32>
    %c1 = arith.constant 1 : index
    %c0_8 = arith.constant 0 : index
    %c0_9 = arith.constant 0 : index
    %7 = vector.load %arg2[%c1, %c0_8, %c0_9] : memref<9x28x64xf32, #tpu.memory_space<vmem>>, vector<1x28x64xf32>
    %8 = vector.shape_cast %7 : vector<1x28x64xf32> to vector<28x64xf32>
    %cst_10 = arith.constant dense<0.000000e+00> : vector<28x64xf32>
    %9 = tpu.matmul %8, %0, %cst_10 {dimension_numbers = #tpu.dot_dimension_numbers<[1], [0], [0], [1], [0, 0, 1, 1], [], []>} : vector<28x64xf32>, vector<64x64xf32>, vector<28x64xf32> -> vector<28x64xf32>
    %c1_11 = arith.constant 1 : index
    %c0_12 = arith.constant 0 : index
    %c0_13 = arith.constant 0 : index
    %10 = vector.load %arg3[%c1_11, %c0_12, %c0_13] : memref<9x64x56xf32, #tpu.memory_space<vmem>>, vector<1x64x56xf32>
    %11 = vector.shape_cast %10 : vector<1x64x56xf32> to vector<64x56xf32>
    %cst_14 = arith.constant dense<0.000000e+00> : vector<28x56xf32>
    %12 = tpu.matmul %9, %11, %cst_14 {dimension_numbers = #tpu.dot_dimension_numbers<[1], [0], [0], [1], [0, 0, 1, 1], [], []>} : vector<28x64xf32>, vector<64x56xf32>, vector<28x56xf32> -> vector<28x56xf32>
    %13 = arith.addf %6, %12 : vector<28x56xf32>
    %c2 = arith.constant 2 : index
    %c0_15 = arith.constant 0 : index
    %c0_16 = arith.constant 0 : index
    %14 = vector.load %arg2[%c2, %c0_15, %c0_16] : memref<9x28x64xf32, #tpu.memory_space<vmem>>, vector<1x28x64xf32>
    %15 = vector.shape_cast %14 : vector<1x28x64xf32> to vector<28x64xf32>
    %cst_17 = arith.constant dense<0.000000e+00> : vector<28x64xf32>
    %16 = tpu.matmul %15, %0, %cst_17 {dimension_numbers = #tpu.dot_dimension_numbers<[1], [0], [0], [1], [0, 0, 1, 1], [], []>} : vector<28x64xf32>, vector<64x64xf32>, vector<28x64xf32> -> vector<28x64xf32>
    %c2_18 = arith.constant 2 : index
    %c0_19 = arith.constant 0 : index
    %c0_20 = arith.constant 0 : index
    %17 = vector.load %arg3[%c2_18, %c0_19, %c0_20] : memref<9x64x56xf32, #tpu.memory_space<vmem>>, vector<1x64x56xf32>
    %18 = vector.shape_cast %17 : vector<1x64x56xf32> to vector<64x56xf32>
    %cst_21 = arith.constant dense<0.000000e+00> : vector<28x56xf32>
    %19 = tpu.matmul %16, %18, %cst_21 {dimension_numbers = #tpu.dot_dimension_numbers<[1], [0], [0], [1], [0, 0, 1, 1], [], []>} : vector<28x64xf32>, vector<64x56xf32>, vector<28x56xf32> -> vector<28x56xf32>
    %20 = arith.addf %13, %19 : vector<28x56xf32>
    %c3 = arith.constant 3 : index
    %c0_22 = arith.constant 0 : index
    %c0_23 = arith.constant 0 : index
    %21 = vector.load %arg2[%c3, %c0_22, %c0_23] : memref<9x28x64xf32, #tpu.memory_space<vmem>>, vector<1x28x64xf32>
    %22 = vector.shape_cast %21 : vector<1x28x64xf32> to vector<28x64xf32>
    %cst_24 = arith.constant dense<0.000000e+00> : vector<28x64xf32>
    %23 = tpu.matmul %22, %0, %cst_24 {dimension_numbers = #tpu.dot_dimension_numbers<[1], [0], [0], [1], [0, 0, 1, 1], [], []>} : vector<28x64xf32>, vector<64x64xf32>, vector<28x64xf32> -> vector<28x64xf32>
    %c3_25 = arith.constant 3 : index
    %c0_26 = arith.constant 0 : index
    %c0_27 = arith.constant 0 : index
    %24 = vector.load %arg3[%c3_25, %c0_26, %c0_27] : memref<9x64x56xf32, #tpu.memory_space<vmem>>, vector<1x64x56xf32>
    %25 = vector.shape_cast %24 : vector<1x64x56xf32> to vector<64x56xf32>
    %cst_28 = arith.constant dense<0.000000e+00> : vector<28x56xf32>
    %26 = tpu.matmul %23, %25, %cst_28 {dimension_numbers = #tpu.dot_dimension_numbers<[1], [0], [0], [1], [0, 0, 1, 1], [], []>} : vector<28x64xf32>, vector<64x56xf32>, vector<28x56xf32> -> vector<28x56xf32>
    %27 = arith.addf %20, %26 : vector<28x56xf32>
    %c4 = arith.constant 4 : index
    %c0_29 = arith.constant 0 : index
    %c0_30 = arith.constant 0 : index
    %28 = vector.load %arg2[%c4, %c0_29, %c0_30] : memref<9x28x64xf32, #tpu.memory_space<vmem>>, vector<1x28x64xf32>
    %29 = vector.shape_cast %28 : vector<1x28x64xf32> to vector<28x64xf32>
    %cst_31 = arith.constant dense<0.000000e+00> : vector<28x64xf32>
    %30 = tpu.matmul %29, %0, %cst_31 {dimension_numbers = #tpu.dot_dimension_numbers<[1], [0], [0], [1], [0, 0, 1, 1], [], []>} : vector<28x64xf32>, vector<64x64xf32>, vector<28x64xf32> -> vector<28x64xf32>
    %c4_32 = arith.constant 4 : index
    %c0_33 = arith.constant 0 : index
    %c0_34 = arith.constant 0 : index
    %31 = vector.load %arg3[%c4_32, %c0_33, %c0_34] : memref<9x64x56xf32, #tpu.memory_space<vmem>>, vector<1x64x56xf32>
    %32 = vector.shape_cast %31 : vector<1x64x56xf32> to vector<64x56xf32>
    %cst_35 = arith.constant dense<0.000000e+00> : vector<28x56xf32>
    %33 = tpu.matmul %30, %32, %cst_35 {dimension_numbers = #tpu.dot_dimension_numbers<[1], [0], [0], [1], [0, 0, 1, 1], [], []>} : vector<28x64xf32>, vector<64x56xf32>, vector<28x56xf32> -> vector<28x56xf32>
    %34 = arith.addf %27, %33 : vector<28x56xf32>
    %c5 = arith.constant 5 : index
    %c0_36 = arith.constant 0 : index
    %c0_37 = arith.constant 0 : index
    %35 = vector.load %arg2[%c5, %c0_36, %c0_37] : memref<9x28x64xf32, #tpu.memory_space<vmem>>, vector<1x28x64xf32>
    %36 = vector.shape_cast %35 : vector<1x28x64xf32> to vector<28x64xf32>
    %cst_38 = arith.constant dense<0.000000e+00> : vector<28x64xf32>
    %37 = tpu.matmul %36, %0, %cst_38 {dimension_numbers = #tpu.dot_dimension_numbers<[1], [0], [0], [1], [0, 0, 1, 1], [], []>} : vector<28x64xf32>, vector<64x64xf32>, vector<28x64xf32> -> vector<28x64xf32>
    %c5_39 = arith.constant 5 : index
    %c0_40 = arith.constant 0 : index
    %c0_41 = arith.constant 0 : index
    %38 = vector.load %arg3[%c5_39, %c0_40, %c0_41] : memref<9x64x56xf32, #tpu.memory_space<vmem>>, vector<1x64x56xf32>
    %39 = vector.shape_cast %38 : vector<1x64x56xf32> to vector<64x56xf32>
    %cst_42 = arith.constant dense<0.000000e+00> : vector<28x56xf32>
    %40 = tpu.matmul %37, %39, %cst_42 {dimension_numbers = #tpu.dot_dimension_numbers<[1], [0], [0], [1], [0, 0, 1, 1], [], []>} : vector<28x64xf32>, vector<64x56xf32>, vector<28x56xf32> -> vector<28x56xf32>
    %41 = arith.addf %34, %40 : vector<28x56xf32>
    %c6 = arith.constant 6 : index
    %c0_43 = arith.constant 0 : index
    %c0_44 = arith.constant 0 : index
    %42 = vector.load %arg2[%c6, %c0_43, %c0_44] : memref<9x28x64xf32, #tpu.memory_space<vmem>>, vector<1x28x64xf32>
    %43 = vector.shape_cast %42 : vector<1x28x64xf32> to vector<28x64xf32>
    %cst_45 = arith.constant dense<0.000000e+00> : vector<28x64xf32>
    %44 = tpu.matmul %43, %0, %cst_45 {dimension_numbers = #tpu.dot_dimension_numbers<[1], [0], [0], [1], [0, 0, 1, 1], [], []>} : vector<28x64xf32>, vector<64x64xf32>, vector<28x64xf32> -> vector<28x64xf32>
    %c6_46 = arith.constant 6 : index
    %c0_47 = arith.constant 0 : index
    %c0_48 = arith.constant 0 : index
    %45 = vector.load %arg3[%c6_46, %c0_47, %c0_48] : memref<9x64x56xf32, #tpu.memory_space<vmem>>, vector<1x64x56xf32>
    %46 = vector.shape_cast %45 : vector<1x64x56xf32> to vector<64x56xf32>
    %cst_49 = arith.constant dense<0.000000e+00> : vector<28x56xf32>
    %47 = tpu.matmul %44, %46, %cst_49 {dimension_numbers = #tpu.dot_dimension_numbers<[1], [0], [0], [1], [0, 0, 1, 1], [], []>} : vector<28x64xf32>, vector<64x56xf32>, vector<28x56xf32> -> vector<28x56xf32>
    %48 = arith.addf %41, %47 : vector<28x56xf32>
    %c7 = arith.constant 7 : index
    %c0_50 = arith.constant 0 : index
    %c0_51 = arith.constant 0 : index
    %49 = vector.load %arg2[%c7, %c0_50, %c0_51] : memref<9x28x64xf32, #tpu.memory_space<vmem>>, vector<1x28x64xf32>
    %50 = vector.shape_cast %49 : vector<1x28x64xf32> to vector<28x64xf32>
    %cst_52 = arith.constant dense<0.000000e+00> : vector<28x64xf32>
    %51 = tpu.matmul %50, %0, %cst_52 {dimension_numbers = #tpu.dot_dimension_numbers<[1], [0], [0], [1], [0, 0, 1, 1], [], []>} : vector<28x64xf32>, vector<64x64xf32>, vector<28x64xf32> -> vector<28x64xf32>
    %c7_53 = arith.constant 7 : index
    %c0_54 = arith.constant 0 : index
    %c0_55 = arith.constant 0 : index
    %52 = vector.load %arg3[%c7_53, %c0_54, %c0_55] : memref<9x64x56xf32, #tpu.memory_space<vmem>>, vector<1x64x56xf32>
    %53 = vector.shape_cast %52 : vector<1x64x56xf32> to vector<64x56xf32>
    %cst_56 = arith.constant dense<0.000000e+00> : vector<28x56xf32>
    %54 = tpu.matmul %51, %53, %cst_56 {dimension_numbers = #tpu.dot_dimension_numbers<[1], [0], [0], [1], [0, 0, 1, 1], [], []>} : vector<28x64xf32>, vector<64x56xf32>, vector<28x56xf32> -> vector<28x56xf32>
    %55 = arith.addf %48, %54 : vector<28x56xf32>
    %c8 = arith.constant 8 : index
    %c0_57 = arith.constant 0 : index
    %c0_58 = arith.constant 0 : index
    %56 = vector.load %arg2[%c8, %c0_57, %c0_58] : memref<9x28x64xf32, #tpu.memory_space<vmem>>, vector<1x28x64xf32>
    %57 = vector.shape_cast %56 : vector<1x28x64xf32> to vector<28x64xf32>
    %cst_59 = arith.constant dense<0.000000e+00> : vector<28x64xf32>
    %58 = tpu.matmul %57, %0, %cst_59 {dimension_numbers = #tpu.dot_dimension_numbers<[1], [0], [0], [1], [0, 0, 1, 1], [], []>} : vector<28x64xf32>, vector<64x64xf32>, vector<28x64xf32> -> vector<28x64xf32>
    %c8_60 = arith.constant 8 : index
    %c0_61 = arith.constant 0 : index
    %c0_62 = arith.constant 0 : index
    %59 = vector.load %arg3[%c8_60, %c0_61, %c0_62] : memref<9x64x56xf32, #tpu.memory_space<vmem>>, vector<1x64x56xf32>
    %60 = vector.shape_cast %59 : vector<1x64x56xf32> to vector<64x56xf32>
    %cst_63 = arith.constant dense<0.000000e+00> : vector<28x56xf32>
    %61 = tpu.matmul %58, %60, %cst_63 {dimension_numbers = #tpu.dot_dimension_numbers<[1], [0], [0], [1], [0, 0, 1, 1], [], []>} : vector<28x64xf32>, vector<64x56xf32>, vector<28x56xf32> -> vector<28x56xf32>
    %62 = arith.addf %55, %61 : vector<28x56xf32>
    %c0_64 = arith.constant 0 : index
    %c0_65 = arith.constant 0 : index
    %63 = vector.load %arg4[%c0_64, %c0_65] : memref<1x56xf32, #tpu.memory_space<vmem>>, vector<1x56xf32>
    %64 = vector.broadcast %63 : vector<1x56xf32> to vector<28x56xf32>
    %65 = arith.addf %62, %64 : vector<28x56xf32>
    %cst_66 = arith.constant 0.000000e+00 : f32
    %66 = vector.broadcast %cst_66 : f32 to vector<28x56xf32>
    %67 = arith.maximumf %65, %66 : vector<28x56xf32>
    %c0_67 = arith.constant 0 : index
    %c0_68 = arith.constant 0 : index
    %68 = vector.load %arg7[%c0_67, %c0_68] : memref<56x56xf32, #tpu.memory_space<vmem>>, vector<56x56xf32>
    %cst_69 = arith.constant dense<0.000000e+00> : vector<56xf32>
    %69 = vector.multi_reduction <add>, %67, %cst_69 [0] : vector<28x56xf32> to vector<56xf32>
    %70 = vector.shape_cast %69 : vector<56xf32> to vector<1x56xf32>
    %cst_70 = arith.constant dense<0.000000e+00> : vector<1x56xf32>
    %71 = tpu.matmul %70, %68, %cst_70 {dimension_numbers = #tpu.dot_dimension_numbers<[1], [0], [0], [1], [0, 0, 1, 1], [], []>} : vector<1x56xf32>, vector<56x56xf32>, vector<1x56xf32> -> vector<1x56xf32>
    %72 = vector.broadcast %71 : vector<1x56xf32> to vector<28x56xf32>
    %73 = arith.subf %67, %72 : vector<28x56xf32>
    %74 = arith.mulf %73, %73 : vector<28x56xf32>
    %cst_71 = arith.constant dense<0.000000e+00> : vector<56xf32>
    %75 = vector.multi_reduction <add>, %74, %cst_71 [0] : vector<28x56xf32> to vector<56xf32>
    %76 = vector.shape_cast %75 : vector<56xf32> to vector<1x56xf32>
    %cst_72 = arith.constant dense<0.000000e+00> : vector<1x56xf32>
    %77 = tpu.matmul %76, %68, %cst_72 {dimension_numbers = #tpu.dot_dimension_numbers<[1], [0], [0], [1], [0, 0, 1, 1], [], []>} : vector<1x56xf32>, vector<56x56xf32>, vector<1x56xf32> -> vector<1x56xf32>
    %c0_73 = arith.constant 0 : index
    %c0_74 = arith.constant 0 : index
    %78 = vector.load %arg5[%c0_73, %c0_74] : memref<1x56xf32, #tpu.memory_space<vmem>>, vector<1x56xf32>
    %cst_75 = arith.constant 9.99999974E-6 : f32
    %79 = vector.broadcast %cst_75 : f32 to vector<1x56xf32>
    %80 = arith.addf %77, %79 : vector<1x56xf32>
    %81 = math.rsqrt %80 : vector<1x56xf32>
    %82 = arith.mulf %78, %81 : vector<1x56xf32>
    %83 = vector.broadcast %82 : vector<1x56xf32> to vector<28x56xf32>
    %84 = arith.mulf %73, %83 : vector<28x56xf32>
    %c0_76 = arith.constant 0 : index
    %c0_77 = arith.constant 0 : index
    %85 = vector.load %arg6[%c0_76, %c0_77] : memref<1x56xf32, #tpu.memory_space<vmem>>, vector<1x56xf32>
    %86 = vector.broadcast %85 : vector<1x56xf32> to vector<28x56xf32>
    %87 = arith.addf %84, %86 : vector<28x56xf32>
    %c0_78 = arith.constant 0 : index
    %c0_79 = arith.constant 0 : index
    %c0_80 = arith.constant 0 : index
    %88 = vector.load %arg8[%c0_78, %c0_79, %c0_80] : memref<9x12x28xf32, #tpu.memory_space<vmem>>, vector<1x12x28xf32>
    %89 = vector.shape_cast %88 : vector<1x12x28xf32> to vector<12x28xf32>
    %cst_81 = arith.constant dense<0.000000e+00> : vector<12x56xf32>
    %90 = tpu.matmul %89, %87, %cst_81 {dimension_numbers = #tpu.dot_dimension_numbers<[1], [0], [0], [1], [0, 0, 1, 1], [], []>} : vector<12x28xf32>, vector<28x56xf32>, vector<12x56xf32> -> vector<12x56xf32>
    %c0_82 = arith.constant 0 : index
    %c0_83 = arith.constant 0 : index
    %c0_84 = arith.constant 0 : index
    %91 = vector.load %arg9[%c0_82, %c0_83, %c0_84] : memref<9x56x384xf32, #tpu.memory_space<vmem>>, vector<1x56x384xf32>
    %92 = vector.shape_cast %91 : vector<1x56x384xf32> to vector<56x384xf32>
    %cst_85 = arith.constant dense<0.000000e+00> : vector<12x384xf32>
    %93 = tpu.matmul %90, %92, %cst_85 {dimension_numbers = #tpu.dot_dimension_numbers<[1], [0], [0], [1], [0, 0, 1, 1], [], []>} : vector<12x56xf32>, vector<56x384xf32>, vector<12x384xf32> -> vector<12x384xf32>
    %c1_86 = arith.constant 1 : index
    %c0_87 = arith.constant 0 : index
    %c0_88 = arith.constant 0 : index
    %94 = vector.load %arg8[%c1_86, %c0_87, %c0_88] : memref<9x12x28xf32, #tpu.memory_space<vmem>>, vector<1x12x28xf32>
    %95 = vector.shape_cast %94 : vector<1x12x28xf32> to vector<12x28xf32>
    %cst_89 = arith.constant dense<0.000000e+00> : vector<12x56xf32>
    %96 = tpu.matmul %95, %87, %cst_89 {dimension_numbers = #tpu.dot_dimension_numbers<[1], [0], [0], [1], [0, 0, 1, 1], [], []>} : vector<12x28xf32>, vector<28x56xf32>, vector<12x56xf32> -> vector<12x56xf32>
    %c1_90 = arith.constant 1 : index
    %c0_91 = arith.constant 0 : index
    %c0_92 = arith.constant 0 : index
    %97 = vector.load %arg9[%c1_90, %c0_91, %c0_92] : memref<9x56x384xf32, #tpu.memory_space<vmem>>, vector<1x56x384xf32>
    %98 = vector.shape_cast %97 : vector<1x56x384xf32> to vector<56x384xf32>
    %cst_93 = arith.constant dense<0.000000e+00> : vector<12x384xf32>
    %99 = tpu.matmul %96, %98, %cst_93 {dimension_numbers = #tpu.dot_dimension_numbers<[1], [0], [0], [1], [0, 0, 1, 1], [], []>} : vector<12x56xf32>, vector<56x384xf32>, vector<12x384xf32> -> vector<12x384xf32>
    %100 = arith.addf %93, %99 : vector<12x384xf32>
    %c2_94 = arith.constant 2 : index
    %c0_95 = arith.constant 0 : index
    %c0_96 = arith.constant 0 : index
    %101 = vector.load %arg8[%c2_94, %c0_95, %c0_96] : memref<9x12x28xf32, #tpu.memory_space<vmem>>, vector<1x12x28xf32>
    %102 = vector.shape_cast %101 : vector<1x12x28xf32> to vector<12x28xf32>
    %cst_97 = arith.constant dense<0.000000e+00> : vector<12x56xf32>
    %103 = tpu.matmul %102, %87, %cst_97 {dimension_numbers = #tpu.dot_dimension_numbers<[1], [0], [0], [1], [0, 0, 1, 1], [], []>} : vector<12x28xf32>, vector<28x56xf32>, vector<12x56xf32> -> vector<12x56xf32>
    %c2_98 = arith.constant 2 : index
    %c0_99 = arith.constant 0 : index
    %c0_100 = arith.constant 0 : index
    %104 = vector.load %arg9[%c2_98, %c0_99, %c0_100] : memref<9x56x384xf32, #tpu.memory_space<vmem>>, vector<1x56x384xf32>
    %105 = vector.shape_cast %104 : vector<1x56x384xf32> to vector<56x384xf32>
    %cst_101 = arith.constant dense<0.000000e+00> : vector<12x384xf32>
    %106 = tpu.matmul %103, %105, %cst_101 {dimension_numbers = #tpu.dot_dimension_numbers<[1], [0], [0], [1], [0, 0, 1, 1], [], []>} : vector<12x56xf32>, vector<56x384xf32>, vector<12x384xf32> -> vector<12x384xf32>
    %107 = arith.addf %100, %106 : vector<12x384xf32>
    %c3_102 = arith.constant 3 : index
    %c0_103 = arith.constant 0 : index
    %c0_104 = arith.constant 0 : index
    %108 = vector.load %arg8[%c3_102, %c0_103, %c0_104] : memref<9x12x28xf32, #tpu.memory_space<vmem>>, vector<1x12x28xf32>
    %109 = vector.shape_cast %108 : vector<1x12x28xf32> to vector<12x28xf32>
    %cst_105 = arith.constant dense<0.000000e+00> : vector<12x56xf32>
    %110 = tpu.matmul %109, %87, %cst_105 {dimension_numbers = #tpu.dot_dimension_numbers<[1], [0], [0], [1], [0, 0, 1, 1], [], []>} : vector<12x28xf32>, vector<28x56xf32>, vector<12x56xf32> -> vector<12x56xf32>
    %c3_106 = arith.constant 3 : index
    %c0_107 = arith.constant 0 : index
    %c0_108 = arith.constant 0 : index
    %111 = vector.load %arg9[%c3_106, %c0_107, %c0_108] : memref<9x56x384xf32, #tpu.memory_space<vmem>>, vector<1x56x384xf32>
    %112 = vector.shape_cast %111 : vector<1x56x384xf32> to vector<56x384xf32>
    %cst_109 = arith.constant dense<0.000000e+00> : vector<12x384xf32>
    %113 = tpu.matmul %110, %112, %cst_109 {dimension_numbers = #tpu.dot_dimension_numbers<[1], [0], [0], [1], [0, 0, 1, 1], [], []>} : vector<12x56xf32>, vector<56x384xf32>, vector<12x384xf32> -> vector<12x384xf32>
    %114 = arith.addf %107, %113 : vector<12x384xf32>
    %c4_110 = arith.constant 4 : index
    %c0_111 = arith.constant 0 : index
    %c0_112 = arith.constant 0 : index
    %115 = vector.load %arg8[%c4_110, %c0_111, %c0_112] : memref<9x12x28xf32, #tpu.memory_space<vmem>>, vector<1x12x28xf32>
    %116 = vector.shape_cast %115 : vector<1x12x28xf32> to vector<12x28xf32>
    %cst_113 = arith.constant dense<0.000000e+00> : vector<12x56xf32>
    %117 = tpu.matmul %116, %87, %cst_113 {dimension_numbers = #tpu.dot_dimension_numbers<[1], [0], [0], [1], [0, 0, 1, 1], [], []>} : vector<12x28xf32>, vector<28x56xf32>, vector<12x56xf32> -> vector<12x56xf32>
    %c4_114 = arith.constant 4 : index
    %c0_115 = arith.constant 0 : index
    %c0_116 = arith.constant 0 : index
    %118 = vector.load %arg9[%c4_114, %c0_115, %c0_116] : memref<9x56x384xf32, #tpu.memory_space<vmem>>, vector<1x56x384xf32>
    %119 = vector.shape_cast %118 : vector<1x56x384xf32> to vector<56x384xf32>
    %cst_117 = arith.constant dense<0.000000e+00> : vector<12x384xf32>
    %120 = tpu.matmul %117, %119, %cst_117 {dimension_numbers = #tpu.dot_dimension_numbers<[1], [0], [0], [1], [0, 0, 1, 1], [], []>} : vector<12x56xf32>, vector<56x384xf32>, vector<12x384xf32> -> vector<12x384xf32>
    %121 = arith.addf %114, %120 : vector<12x384xf32>
    %c5_118 = arith.constant 5 : index
    %c0_119 = arith.constant 0 : index
    %c0_120 = arith.constant 0 : index
    %122 = vector.load %arg8[%c5_118, %c0_119, %c0_120] : memref<9x12x28xf32, #tpu.memory_space<vmem>>, vector<1x12x28xf32>
    %123 = vector.shape_cast %122 : vector<1x12x28xf32> to vector<12x28xf32>
    %cst_121 = arith.constant dense<0.000000e+00> : vector<12x56xf32>
    %124 = tpu.matmul %123, %87, %cst_121 {dimension_numbers = #tpu.dot_dimension_numbers<[1], [0], [0], [1], [0, 0, 1, 1], [], []>} : vector<12x28xf32>, vector<28x56xf32>, vector<12x56xf32> -> vector<12x56xf32>
    %c5_122 = arith.constant 5 : index
    %c0_123 = arith.constant 0 : index
    %c0_124 = arith.constant 0 : index
    %125 = vector.load %arg9[%c5_122, %c0_123, %c0_124] : memref<9x56x384xf32, #tpu.memory_space<vmem>>, vector<1x56x384xf32>
    %126 = vector.shape_cast %125 : vector<1x56x384xf32> to vector<56x384xf32>
    %cst_125 = arith.constant dense<0.000000e+00> : vector<12x384xf32>
    %127 = tpu.matmul %124, %126, %cst_125 {dimension_numbers = #tpu.dot_dimension_numbers<[1], [0], [0], [1], [0, 0, 1, 1], [], []>} : vector<12x56xf32>, vector<56x384xf32>, vector<12x384xf32> -> vector<12x384xf32>
    %128 = arith.addf %121, %127 : vector<12x384xf32>
    %c6_126 = arith.constant 6 : index
    %c0_127 = arith.constant 0 : index
    %c0_128 = arith.constant 0 : index
    %129 = vector.load %arg8[%c6_126, %c0_127, %c0_128] : memref<9x12x28xf32, #tpu.memory_space<vmem>>, vector<1x12x28xf32>
    %130 = vector.shape_cast %129 : vector<1x12x28xf32> to vector<12x28xf32>
    %cst_129 = arith.constant dense<0.000000e+00> : vector<12x56xf32>
    %131 = tpu.matmul %130, %87, %cst_129 {dimension_numbers = #tpu.dot_dimension_numbers<[1], [0], [0], [1], [0, 0, 1, 1], [], []>} : vector<12x28xf32>, vector<28x56xf32>, vector<12x56xf32> -> vector<12x56xf32>
    %c6_130 = arith.constant 6 : index
    %c0_131 = arith.constant 0 : index
    %c0_132 = arith.constant 0 : index
    %132 = vector.load %arg9[%c6_130, %c0_131, %c0_132] : memref<9x56x384xf32, #tpu.memory_space<vmem>>, vector<1x56x384xf32>
    %133 = vector.shape_cast %132 : vector<1x56x384xf32> to vector<56x384xf32>
    %cst_133 = arith.constant dense<0.000000e+00> : vector<12x384xf32>
    %134 = tpu.matmul %131, %133, %cst_133 {dimension_numbers = #tpu.dot_dimension_numbers<[1], [0], [0], [1], [0, 0, 1, 1], [], []>} : vector<12x56xf32>, vector<56x384xf32>, vector<12x384xf32> -> vector<12x384xf32>
    %135 = arith.addf %128, %134 : vector<12x384xf32>
    %c7_134 = arith.constant 7 : index
    %c0_135 = arith.constant 0 : index
    %c0_136 = arith.constant 0 : index
    %136 = vector.load %arg8[%c7_134, %c0_135, %c0_136] : memref<9x12x28xf32, #tpu.memory_space<vmem>>, vector<1x12x28xf32>
    %137 = vector.shape_cast %136 : vector<1x12x28xf32> to vector<12x28xf32>
    %cst_137 = arith.constant dense<0.000000e+00> : vector<12x56xf32>
    %138 = tpu.matmul %137, %87, %cst_137 {dimension_numbers = #tpu.dot_dimension_numbers<[1], [0], [0], [1], [0, 0, 1, 1], [], []>} : vector<12x28xf32>, vector<28x56xf32>, vector<12x56xf32> -> vector<12x56xf32>
    %c7_138 = arith.constant 7 : index
    %c0_139 = arith.constant 0 : index
    %c0_140 = arith.constant 0 : index
    %139 = vector.load %arg9[%c7_138, %c0_139, %c0_140] : memref<9x56x384xf32, #tpu.memory_space<vmem>>, vector<1x56x384xf32>
    %140 = vector.shape_cast %139 : vector<1x56x384xf32> to vector<56x384xf32>
    %cst_141 = arith.constant dense<0.000000e+00> : vector<12x384xf32>
    %141 = tpu.matmul %138, %140, %cst_141 {dimension_numbers = #tpu.dot_dimension_numbers<[1], [0], [0], [1], [0, 0, 1, 1], [], []>} : vector<12x56xf32>, vector<56x384xf32>, vector<12x384xf32> -> vector<12x384xf32>
    %142 = arith.addf %135, %141 : vector<12x384xf32>
    %c8_142 = arith.constant 8 : index
    %c0_143 = arith.constant 0 : index
    %c0_144 = arith.constant 0 : index
    %143 = vector.load %arg8[%c8_142, %c0_143, %c0_144] : memref<9x12x28xf32, #tpu.memory_space<vmem>>, vector<1x12x28xf32>
    %144 = vector.shape_cast %143 : vector<1x12x28xf32> to vector<12x28xf32>
    %cst_145 = arith.constant dense<0.000000e+00> : vector<12x56xf32>
    %145 = tpu.matmul %144, %87, %cst_145 {dimension_numbers = #tpu.dot_dimension_numbers<[1], [0], [0], [1], [0, 0, 1, 1], [], []>} : vector<12x28xf32>, vector<28x56xf32>, vector<12x56xf32> -> vector<12x56xf32>
    %c8_146 = arith.constant 8 : index
    %c0_147 = arith.constant 0 : index
    %c0_148 = arith.constant 0 : index
    %146 = vector.load %arg9[%c8_146, %c0_147, %c0_148] : memref<9x56x384xf32, #tpu.memory_space<vmem>>, vector<1x56x384xf32>
    %147 = vector.shape_cast %146 : vector<1x56x384xf32> to vector<56x384xf32>
    %cst_149 = arith.constant dense<0.000000e+00> : vector<12x384xf32>
    %148 = tpu.matmul %145, %147, %cst_149 {dimension_numbers = #tpu.dot_dimension_numbers<[1], [0], [0], [1], [0, 0, 1, 1], [], []>} : vector<12x56xf32>, vector<56x384xf32>, vector<12x384xf32> -> vector<12x384xf32>
    %149 = arith.addf %142, %148 : vector<12x384xf32>
    %c0_150 = arith.constant 0 : index
    %c0_151 = arith.constant 0 : index
    %150 = vector.load %arg10[%c0_150, %c0_151] : memref<1x384xf32, #tpu.memory_space<vmem>>, vector<1x384xf32>
    %151 = vector.broadcast %150 : vector<1x384xf32> to vector<12x384xf32>
    %152 = arith.addf %149, %151 : vector<12x384xf32>
    %c0_152 = arith.constant 0 : index
    %c0_153 = arith.constant 0 : index
    %153 = vector.load %arg11[%c0_152, %c0_153] : memref<12x384xf32, #tpu.memory_space<vmem>>, vector<12x384xf32>
    tpu.vector_store %arg11[%c0_152, %c0_153], %152 {strides = array<i32>} : memref<12x384xf32, #tpu.memory_space<vmem>>, vector<12x384xf32>,
    return
  }
  func.func @transform_0(%arg0: i32) -> (i32, i32) {
    %c0_i32 = arith.constant 0 : i32
    %c0_i32_0 = arith.constant 0 : i32
    %c0_i32_1 = arith.constant 0 : i32
    return %c0_i32, %c0_i32_0 : i32, i32
  }
  func.func @transform_1(%arg0: i32) -> (i32, i32, i32) {
    %c0_i32 = arith.constant 0 : i32
    %c0_i32_0 = arith.constant 0 : i32
    %c0_i32_1 = arith.constant 0 : i32
    %c0_i32_2 = arith.constant 0 : i32
    return %c0_i32, %c0_i32_0, %c0_i32_1 : i32, i32, i32
  }
  func.func @transform_2(%arg0: i32) -> (i32, i32, i32) {
    %c0_i32 = arith.constant 0 : i32
    %c0_i32_0 = arith.constant 0 : i32
    %c0_i32_1 = arith.constant 0 : i32
    %c0_i32_2 = arith.constant 0 : i32
    return %c0_i32, %c0_i32_0, %c0_i32_1 : i32, i32, i32
  }
  func.func @transform_3(%arg0: i32) -> (i32, i32) {
    %c0_i32 = arith.constant 0 : i32
    %c0_i32_0 = arith.constant 0 : i32
    %c0_i32_1 = arith.constant 0 : i32
    return %c0_i32, %c0_i32_0 : i32, i32
  }
  func.func @transform_4(%arg0: i32) -> (i32, i32) {
    %c0_i32 = arith.constant 0 : i32
    %c0_i32_0 = arith.constant 0 : i32
    %c0_i32_1 = arith.constant 0 : i32
    return %c0_i32, %c0_i32_0 : i32, i32
  }
  func.func @transform_5(%arg0: i32) -> (i32, i32) {
    %c0_i32 = arith.constant 0 : i32
    %c0_i32_0 = arith.constant 0 : i32
    %c0_i32_1 = arith.constant 0 : i32
    return %c0_i32, %c0_i32_0 : i32, i32
  }
  func.func @transform_6(%arg0: i32) -> (i32, i32) {
    %c0_i32 = arith.constant 0 : i32
    %c0_i32_0 = arith.constant 0 : i32
    %c0_i32_1 = arith.constant 0 : i32
    return %c0_i32, %c0_i32_0 : i32, i32
  }
  func.func @transform_7(%arg0: i32) -> (i32, i32, i32) {
    %c0_i32 = arith.constant 0 : i32
    %c0_i32_0 = arith.constant 0 : i32
    %c0_i32_1 = arith.constant 0 : i32
    %c0_i32_2 = arith.constant 0 : i32
    return %c0_i32, %c0_i32_0, %c0_i32_1 : i32, i32, i32
  }
  func.func @transform_8(%arg0: i32) -> (i32, i32, i32) {
    %c0_i32 = arith.constant 0 : i32
    %c0_i32_0 = arith.constant 0 : i32
    %c0_i32_1 = arith.constant 0 : i32
    %c0_i32_2 = arith.constant 0 : i32
    return %c0_i32, %c0_i32_0, %c0_i32_1 : i32, i32, i32
  }
  func.func @transform_9(%arg0: i32) -> (i32, i32) {
    %c0_i32 = arith.constant 0 : i32
    %c0_i32_0 = arith.constant 0 : i32
    %c0_i32_1 = arith.constant 0 : i32
    return %c0_i32, %c0_i32_0 : i32, i32
  }
  func.func @transform_10(%arg0: i32) -> (i32, i32) {
    %c0_i32 = arith.constant 0 : i32
    %c0_i32_0 = arith.constant 0 : i32
    %c0_i32_1 = arith.constant 0 : i32
    return %c0_i32, %c0_i32_0 : i32, i32
  }
}

</mosaic_0001>

<bundles_post_ra>
// kernel: tpu_custom_call.1
= control target key start
LH: loop header
LB: loop body
LE: loop exit
PB: predicated region body
PF: predicated region fallthrough
CT: control target
= control target key end

     0   :  { %15 = vsyncpa [#allocation3], 0  ;;  %s7074_s0 = inlined_call_operand.vmem [shape: f32[64,64], index: 0, kind: input, shape index: {}]   ;;  %s7075_s1 = inlined_call_operand.vmem [shape: f32[9,28,64], index: 1, kind: input, shape index: {}]   ;;  %s7076_s2 = inlined_call_operand.vmem [shape: f32[9,64,56], index: 2, kind: input, shape index: {}]   ;;  %s7077_s3 = inlined_call_operand.vmem [shape: f32[1,56], index: 3, kind: input, shape index: {}]   ;;  %s7078_s4 = inlined_call_operand.vmem [shape: f32[1,56], index: 4, kind: input, shape index: {}]   ;;  %s7079_s5 = inlined_call_operand.vmem [shape: f32[1,56], index: 5, kind: input, shape index: {}]   ;;  %s7080_s6 = inlined_call_operand.vmem [shape: f32[56,56], index: 6, kind: input, shape index: {}]   ;;  %s7081_s7 = inlined_call_operand.vmem [shape: f32[9,12,28], index: 7, kind: input, shape index: {}]   ;;  %s7082_s8 = inlined_call_operand.hbm [shape: f32[9,56,384], index: 8, kind: input, shape index: {}]   ;;  %s7083_s9 = inlined_call_operand.vmem [shape: f32[1,384], index: 9, kind: input, shape index: {}]   ;;  %s7084_s10 = inlined_call_operand.hbm [shape: f32[12,384], index: 10, kind: output, shape index: {}]  }
   0x1   :  { %16 = vsyncpa [#allocation4], 0  ;;  %s6008_s13 = smov [#allocation2]  }
   0x2   :  { %s38_s14 = sshll.u32 %s6008_s13, 4  ;;  %s39_s14 = int_to_ptr.vmem [resolvable:$true] %s38_s14 }
   0x3   :  { %s5972_s15 = scalar_lea.vmem %s39_s14, 24192  ;;  %p5977_p1 = scmp.lt.s32.totalorder %s39_s14, %s39_s14 }
   0x4   :  { %p5973_p0 = scmp.ne.s32.totalorder %s39_s14, %s5972_s15  ;;  %p5978_p2 = scmp.lt.s32.totalorder %s5972_s15, %s5972_s15 }
   0x6   :  { %p5979_p3 = por %p5978_p2, %p5977_p1 }
   0x8   :  { %p5980_p4 = pnand %p5979_p3, %p5973_p0 }
   0xa   :  { %5983 = shalt.err (!%p5980_p4)
}
   0xb   :  { %s6009_s16 = smov 384   ;;  %s6010_s17 = smov 24  }
   0xc   :  { %44 = dma.hbm_to_vmem [thread:$0]  %s7082_s8, 24192, %s39_s14, [#allocation3], %s6009_s16, %s6009_s16, %s6010_s17  }
   0xd   :  { %6004 = dma.done.wait [#allocation3], 24192  }
   0xe   :  { %6005 = vsyncadd [#allocation3], 4294943104  ;;  %v6078_v0 = vld [vmem:[%s7074_s0 + $0x38] sm:$0xff]  ;;  %v6083_v1 = vld [vmem:[%s7074_s0 + $0x30] sm:$0xff]  ;;  %vm62_vm0 = vcmask 523264   ;;  %vm6012_vm1 = vmmov 0  }
   0xf   :  { %5274 = vmatprep.subr.mxu0 %v6078_v0  ;;  %5296 = vmatprep.subr.mxu1 %v6078_v0  ;;  %v6092_v2 = vld [vmem:[%s7074_s0 + $0x28] sm:$0xff]  ;;  %v6101_v3 = vld [vmem:[%s7074_s0 + $0x20] sm:$0xff]  ;;  %v6110_v4 = vld [vmem:[%s7074_s0 + $0x18] sm:$0xff]  ;;  %vm1979_vm2 = vcmask 457728   ;;  %vm1985_vm3 = vcmask 453632   ;;  %vm2191_vm4 = vcmask 228352  }
  0x10   :  { %5275 = vmatpush3.msra.mxu0 %v6078_v0  ;;  %5297 = vmatpush3.msra.mxu1 %v6078_v0  ;;  %v6119_v5 = vld [vmem:[%s7074_s0 + $0x10] sm:$0xff]  ;;  %v6128_v6 = vld [vmem:[%s7074_s0 + $0x8] sm:$0xff]  ;;  %v6137_v7 = vld [vmem:[%s7074_s0] sm:$0xff]  ;;  %vm2198_vm5 = vcmask 1043456  }
  0x11   :  { %5276 = vmatprep.subr.mxu0 %v6083_v1  ;;  %5298 = vmatprep.subr.mxu1 %v6083_v1  ;;  %v58_v8 = vld [vmem:[%s7075_s1] sm:$0xff]  ;;  %v59_v10 = vld [vmem:[%s7075_s1 + $0x8] sm:$0xff]  ;;  %v60_v12 = vld [vmem:[%s7075_s1 + $0x10] sm:$0xff] }
  0x12   :  { %5277 = vmatpush3.msra.mxu0 %v6083_v1  ;;  %5299 = vmatpush3.msra.mxu1 %v6083_v1  ;;  %v4660_v9 = vld [vmem:[%s7075_s1 + $0x20] sm:$0xff]  ;;  %v4661_v11 = vld [vmem:[%s7075_s1 + $0x28] sm:$0xff]  ;;  %v4662_v13 = vld [vmem:[%s7075_s1 + $0x30] sm:$0xff] }
  0x13   :  { %5278 = vmatprep.subr.mxu0 %v6092_v2  ;;  %5300 = vmatprep.subr.mxu1 %v6092_v2  ;;  %v4675_v14 = vld [vmem:[%s7076_s2 + $0x78] sm:$0xff]  ;;  %v4674_v18 = vld [vmem:[%s7076_s2 + $0x70] sm:$0xff]  ;;  %v4673_v20 = vld [vmem:[%s7076_s2 + $0x68] sm:$0xff] }
  0x14   :  { %5279 = vmatpush3.msra.mxu0 %v6092_v2  ;;  %5301 = vmatpush3.msra.mxu1 %v6092_v2  ;;  %v167_v15 = vld [vmem:[%s7076_s2 + $0x38] sm:$0xff]  ;;  %v166_v19 = vld [vmem:[%s7076_s2 + $0x30] sm:$0xff]  ;;  %v165_v21 = vld [vmem:[%s7076_s2 + $0x28] sm:$0xff] }
  0x15   :  { %5280 = vmatprep.subr.mxu0 %v6101_v3  ;;  %5302 = vmatprep.subr.mxu1 %v6101_v3  ;;  %v61_v16 = vld [vmem:[%s7075_s1 + $0x18] sm:$0xf]  ;;  %v4672_v22 = vld [vmem:[%s7076_s2 + $0x60] sm:$0xff]  ;;  %v4670_v26 = vld [vmem:[%s7076_s2 + $0x50] sm:$0xff] }
  0x16   :  { %5281 = vmatpush3.msra.mxu0 %v6101_v3  ;;  %5303 = vmatpush3.msra.mxu1 %v6101_v3  ;;  %v4663_v17 = vld [vmem:[%s7075_s1 + $0x38] sm:$0xf]  ;;  %v164_v23 = vld [vmem:[%s7076_s2 + $0x20] sm:$0xff]  ;;  %v162_v27 = vld [vmem:[%s7076_s2 + $0x10] sm:$0xff] }
  0x17   :  { %5282 = vmatprep.subr.mxu0 %v6110_v4  ;;  %5304 = vmatprep.subr.mxu1 %v6110_v4  ;;  %v4671_v24 = vld [vmem:[%s7076_s2 + $0x58] sm:$0xff]  ;;  %v4669_v28 = vld [vmem:[%s7076_s2 + $0x48] sm:$0xff]  ;;  %v4668_v30 = vld [vmem:[%s7076_s2 + $0x40] sm:$0xff] }
  0x18   :  { %5283 = vmatpush3.msra.mxu0 %v6110_v4  ;;  %5305 = vmatpush3.msra.mxu1 %v6110_v4  ;;  %v163_v25 = vld [vmem:[%s7076_s2 + $0x18] sm:$0xff]  ;;  %v161_v29 = vld [vmem:[%s7076_s2 + $0x8] sm:$0xff]  ;;  %v160_v31 = vld [vmem:[%s7076_s2] sm:$0xff] }
  0x19   :  { %5284 = vmatprep.subr.mxu0 %v6119_v5  ;;  %5306 = vmatprep.subr.mxu1 %v6119_v5  ;;  %v4684_v40 = vld [vmem:[%s7075_s1 + $0x40] sm:$0xff]  ;;  %v4685_v41 = vld [vmem:[%s7075_s1 + $0x48] sm:$0xff]  ;;  %v4686_v42 = vld [vmem:[%s7075_s1 + $0x50] sm:$0xff] }
  0x1a   :  { %5285 = vmatpush3.msra.mxu0 %v6119_v5  ;;  %5307 = vmatpush3.msra.mxu1 %v6119_v5  ;;  %v4687_v43 = vld [vmem:[%s7075_s1 + $0x58] sm:$0xf]  ;;  %v4704_v44 = vld [vmem:[%s7075_s1 + $0x60] sm:$0xff]  ;;  %v4705_v45 = vld [vmem:[%s7075_s1 + $0x68] sm:$0xff] }
  0x1b   :  { %5286 = vmatprep.subr.mxu0 %v6128_v6  ;;  %5308 = vmatprep.subr.mxu1 %v6128_v6  ;;  %v4706_v46 = vld [vmem:[%s7075_s1 + $0x70] sm:$0xff]  ;;  %v4707_v47 = vld [vmem:[%s7075_s1 + $0x78] sm:$0xf]  ;;  %v4724_v48 = vld [vmem:[%s7075_s1 + $0x80] sm:$0xff] }
  0x1c   :  { %5287 = vmatpush3.msra.mxu0 %v6128_v6  ;;  %5309 = vmatpush3.msra.mxu1 %v6128_v6  ;;  %v4725_v49 = vld [vmem:[%s7075_s1 + $0x88] sm:$0xff]  ;;  %v4726_v50 = vld [vmem:[%s7075_s1 + $0x90] sm:$0xff]  ;;  %v4727_v51 = vld [vmem:[%s7075_s1 + $0x98] sm:$0xf] }
  0x1d   :  { %5288 = vmatprep.subr.mxu0 %v6137_v7  ;;  %5310 = vmatprep.subr.mxu1 %v6137_v7  ;;  %v4744_v52 = vld [vmem:[%s7075_s1 + $0xa0] sm:$0xff]  ;;  %v4745_v53 = vld [vmem:[%s7075_s1 + $0xa8] sm:$0xff]  ;;  %v4746_v54 = vld [vmem:[%s7075_s1 + $0xb0] sm:$0xff] }
  0x1e   :  { %5289 = vmatpush3.msra.mxu0 %v6137_v7  ;;  %5290 = vmatprep.mubr.msk.f32.mxu0 %vm62_vm0, %v58_v8  ;;  %v4747_v55 = vld [vmem:[%s7075_s1 + $0xb8] sm:$0xf]  ;;  %v4764_v56 = vld [vmem:[%s7075_s1 + $0xc0] sm:$0xff]  ;;  %v4698_v58 = vld [vmem:[%s7076_s2 + $0xb0] sm:$0xff] }
  0x1f   :  { %5311 = vmatpush3.msra.mxu1 %v6137_v7  ;;  %5312 = vmatprep.mubr.msk.f32.mxu1 %vm62_vm0, %v4660_v9  ;;  %v4699_v57 = vld [vmem:[%s7076_s2 + $0xb8] sm:$0xff]  ;;  %v4697_v59 = vld [vmem:[%s7076_s2 + $0xa8] sm:$0xff]  ;;  %v4696_v60 = vld [vmem:[%s7076_s2 + $0xa0] sm:$0xff] }
  0x20   :  { %5291 = vmatmul.mubr.msk.f32.vlgmr.msra.gmra.mxu0 %vm62_vm0, %v59_v10  ;;  %5313 = vmatmul.mubr.msk.f32.vlgmr.msra.gmra.mxu1 %vm62_vm0, %v4661_v11  ;;  %v4695_v61 = vld [vmem:[%s7076_s2 + $0x98] sm:$0xff]  ;;  %v4765_v62 = vld [vmem:[%s7075_s1 + $0xc8] sm:$0xff]  ;;  %v4766_v63 = vld [vmem:[%s7075_s1 + $0xd0] sm:$0xff] }
  0x21   :  { %5293 = vmatprep.mubr.msk.f32.mxu0 %vm62_vm0, %v60_v12  ;;  %5315 = vmatprep.mubr.msk.f32.mxu1 %vm62_vm0, %v4662_v13  ;;  %v4694_v8 = vld [vmem:[%s7076_s2 + $0x90] sm:$0xff]  ;;  %v4767_v9 = vld [vmem:[%s7075_s1 + $0xd8] sm:$0xf]  ;;  %v4784_v10 = vld [vmem:[%s7075_s1 + $0xe0] sm:$0xff] }
  0x22   :  { %5318 = vmatprep.subr.mxu0 %v4675_v14  ;;  %5340 = vmatprep.subr.mxu1 %v167_v15  ;;  %v4693_v11 = vld [vmem:[%s7076_s2 + $0x88] sm:$0xff]  ;;  %v4692_v12 = vld [vmem:[%s7076_s2 + $0x80] sm:$0xff]  ;;  %v4719_v13 = vld [vmem:[%s7076_s2 + $0xf8] sm:$0xff] }
  0x23   :  { %5319 = vmatpush3.msra.mxu0 %v4675_v14  ;;  %5341 = vmatpush3.msra.mxu1 %v167_v15  ;;  %v4785_v14 = vld [vmem:[%s7075_s1 + $0xe8] sm:$0xff]  ;;  %v4786_v15 = vld [vmem:[%s7075_s1 + $0xf0] sm:$0xff] }
  0x24   :  { %5294 = vmatmul.mubr.msk.f32.gmra.mxu0 %vm62_vm0, %v61_v16  ;;  %5316 = vmatmul.mubr.msk.f32.gmra.mxu1 %vm62_vm0, %v4663_v17  ;;  %v4787_v16 = vld [vmem:[%s7075_s1 + $0xf8] sm:$0xf]  ;;  %v4804_v17 = vld [vmem:[%s7075_s1 + $0x100] sm:$0xff] }
  0x25   :  { %5320 = vmatprep.subr.mxu0 %v4674_v18  ;;  %5342 = vmatprep.subr.mxu1 %v166_v19 }
  0x26   :  { %5321 = vmatpush3.msra.mxu0 %v4674_v18  ;;  %5343 = vmatpush3.msra.mxu1 %v166_v19  ;;  %v4718_v19 = vld [vmem:[%s7076_s2 + $0xf0] sm:$0xff] }
  0x27   :  { %5322 = vmatprep.subr.mxu0 %v4673_v20  ;;  %5344 = vmatprep.subr.mxu1 %v165_v21 }
  0x28   :  { %5323 = vmatpush3.msra.mxu0 %v4673_v20  ;;  %5345 = vmatpush3.msra.mxu1 %v165_v21  ;;  %v4717_v21 = vld [vmem:[%s7076_s2 + $0xe8] sm:$0xff] }
  0x29   :  { %5324 = vmatprep.subr.mxu0 %v4672_v22  ;;  %5346 = vmatprep.subr.mxu1 %v164_v23 }
  0x2a   :  { %5325 = vmatpush3.msra.mxu0 %v4672_v22  ;;  %5347 = vmatpush3.msra.mxu1 %v164_v23  ;;  %v4716_v23 = vld [vmem:[%s7076_s2 + $0xe0] sm:$0xff] }
  0x2b   :  { %5326 = vmatprep.subr.mxu0 %v4671_v24  ;;  %5348 = vmatprep.subr.mxu1 %v163_v25 }
  0x2c   :  { %5327 = vmatpush3.msra.mxu0 %v4671_v24  ;;  %5349 = vmatpush3.msra.mxu1 %v163_v25  ;;  %v4715_v24 = vld [vmem:[%s7076_s2 + $0xd8] sm:$0xff]  ;;  %v4714_v25 = vld [vmem:[%s7076_s2 + $0xd0] sm:$0xff] }
  0x2d   :  { %5328 = vmatprep.subr.mxu0 %v4670_v26  ;;  %5350 = vmatprep.subr.mxu1 %v162_v27 }
  0x2e   :  { %5329 = vmatpush3.msra.mxu0 %v4670_v26  ;;  %5351 = vmatpush3.msra.mxu1 %v162_v27  ;;  %v4713_v26 = vld [vmem:[%s7076_s2 + $0xc8] sm:$0xff]  ;;  %v4712_v27 = vld [vmem:[%s7076_s2 + $0xc0] sm:$0xff] }
  0x2f   :  { %5330 = vmatprep.subr.mxu0 %v4669_v28  ;;  %5352 = vmatprep.subr.mxu1 %v161_v29 }
  0x30   :  { %5331 = vmatpush3.msra.mxu0 %v4669_v28  ;;  %5353 = vmatpush3.msra.mxu1 %v161_v29  ;;  %v4739_v29 = vld [vmem:[%s7076_s2 + $0x138] sm:$0xff] }
  0x31   :  { %5332 = vmatprep.subr.mxu0 %v4668_v30  ;;  %5354 = vmatprep.subr.mxu1 %v160_v31 }
  0x32   :  { %5333 = vmatpush3.msra.mxu0 %v4668_v30  ;;  %5355 = vmatpush3.msra.mxu1 %v160_v31  ;;  %v4738_v31 = vld [vmem:[%s7076_s2 + $0x130] sm:$0xff] }
  0x33   :  { %5362 = vmatprep.subr.mxu0 %v6078_v0  ;;  %5384 = vmatprep.subr.mxu1 %v4699_v57 }
  0xe0   :  { %v5292_v32 = vpop.f32.mrf.mxu0  ;;  %v5314_v33 = vpop.f32.mrf.mxu1 }
  0xe2   :  { %v141_v34 = vpop.f32.mrf.mxu0  ;;  %v251_v35 = vpop.f32.mrf.mxu1 }
  0xe3   :  { %5334 = vmatprep.mubr.msk.f32.mxu0 %vm62_vm0, %v251_v35  ;;  %5356 = vmatprep.mubr.msk.f32.mxu1 %vm62_vm0, %v141_v34  ;;  %v4736_v35 = vld [vmem:[%s7076_s2 + $0x120] sm:$0xff] }
  0xe4   :  { %5335 = vmatmul.mubr.msk.f32.vlgmr.msra.gmra.mxu0 %vm62_vm0, %v5314_v33  ;;  %5357 = vmatmul.mubr.msk.f32.vlgmr.msra.gmra.mxu1 %vm62_vm0, %v5292_v32  ;;  %v5295_v36 = vpop.f32.mrf.mxu0  ;;  %v5317_v37 = vpop.f32.mrf.mxu1  ;;  %v4737_v33 = vld [vmem:[%s7076_s2 + $0x128] sm:$0xff] }
  0xe5   :  { %5363 = vmatpush3.msra.mxu0 %v6078_v0  ;;  %5385 = vmatpush3.msra.mxu1 %v4699_v57  ;;  %v4777_v57 = vld [vmem:[%s7076_s2 + $0x1a8] sm:$0xff] }
  0xe6   :  { %5364 = vmatprep.subr.mxu0 %v6083_v1  ;;  %v151_v38 = vpop.f32.mrf.mxu0  ;;  %v261_v39 = vpop.f32.mrf.mxu1  ;;  %5386 = vmatprep.subr.mxu1 %v4698_v58 }
  0xe7   :  { %5365 = vmatpush3.msra.mxu0 %v6083_v1  ;;  %5337 = vmatprep.mubr.msk.f32.mxu0 %vm62_vm0, %v261_v39  ;;  %v4732_v39 = vld [vmem:[%s7076_s2 + $0x100] sm:$0xff] }
  0xe8   :  { %5366 = vmatprep.subr.mxu0 %v6092_v2  ;;  %5359 = vmatprep.mubr.msk.f32.mxu1 %vm62_vm0, %v151_v38  ;;  %v4733_v38 = vld [vmem:[%s7076_s2 + $0x108] sm:$0xff] }
  0xe9   :  { %5367 = vmatpush3.msra.mxu0 %v6092_v2  ;;  %5360 = vmatmul.mubr.msk.f32.gmra.mxu1 %vm62_vm0, %v5295_v36  ;;  %v4735_v36 = vld [vmem:[%s7076_s2 + $0x118] sm:$0xff] }
  0xea   :  { %5368 = vmatprep.subr.mxu0 %v6101_v3  ;;  %5338 = vmatmul.mubr.msk.f32.gmra.mxu0 %vm62_vm0, %v5317_v37  ;;  %v4734_v37 = vld [vmem:[%s7076_s2 + $0x110] sm:$0xff] }
  0xeb   :  { %5369 = vmatpush3.msra.mxu0 %v6101_v3  ;;  %5378 = vmatprep.mubr.msk.f32.mxu0 %vm62_vm0, %v4684_v40 }
  0xec   :  { %5370 = vmatprep.subr.mxu0 %v6110_v4  ;;  %5387 = vmatpush3.msra.mxu1 %v4698_v58 }
  0xed   :  { %5371 = vmatpush3.msra.mxu0 %v6110_v4  ;;  %5388 = vmatprep.subr.mxu1 %v4697_v59 }
  0xee   :  { %5372 = vmatprep.subr.mxu0 %v6119_v5  ;;  %5389 = vmatpush3.msra.mxu1 %v4697_v59  ;;  %v4776_v59 = vld [vmem:[%s7076_s2 + $0x1a0] sm:$0xff] }
  0xef   :  { %5373 = vmatpush3.msra.mxu0 %v6119_v5  ;;  %5390 = vmatprep.subr.mxu1 %v4696_v60 }
  0xf0   :  { %5374 = vmatprep.subr.mxu0 %v6128_v6  ;;  %5391 = vmatpush3.msra.mxu1 %v4696_v60  ;;  %v4775_v60 = vld [vmem:[%s7076_s2 + $0x198] sm:$0xff] }
  0xf1   :  { %5375 = vmatpush3.msra.mxu0 %v6128_v6  ;;  %5392 = vmatprep.subr.mxu1 %v4695_v61 }
  0xf2   :  { %5376 = vmatprep.subr.mxu0 %v6137_v7  ;;  %5393 = vmatpush3.msra.mxu1 %v4695_v61  ;;  %v4774_v61 = vld [vmem:[%s7076_s2 + $0x190] sm:$0xff] }
  0xf3   :  { %5377 = vmatpush3.msra.mxu0 %v6137_v7  ;;  %5394 = vmatprep.subr.mxu1 %v4694_v8 }
  0xf4   :  { %5379 = vmatmul.mubr.msk.f32.vlgmr.msra.gmra.mxu0 %vm62_vm0, %v4685_v41  ;;  %5406 = vmatprep.subr.mxu0 %v6078_v0  ;;  %v4759_v41 = vld [vmem:[%s7076_s2 + $0x178] sm:$0xff] }
  0xf5   :  { %5407 = vmatpush3.msra.mxu0 %v6078_v0  ;;  %5381 = vmatprep.mubr.msk.f32.mxu0 %vm62_vm0, %v4686_v42 }
  0xf6   :  { %5408 = vmatprep.subr.mxu0 %v6083_v1  ;;  %5395 = vmatpush3.msra.mxu1 %v4694_v8 }
  0xf7   :  { %5409 = vmatpush3.msra.mxu0 %v6083_v1  ;;  %5396 = vmatprep.subr.mxu1 %v4693_v11 }
  0xf8   :  { %5382 = vmatmul.mubr.msk.f32.gmra.mxu0 %vm62_vm0, %v4687_v43  ;;  %5410 = vmatprep.subr.mxu0 %v6092_v2  ;;  %v4758_v43 = vld [vmem:[%s7076_s2 + $0x170] sm:$0xff] }
  0xf9   :  { %5411 = vmatpush3.msra.mxu0 %v6092_v2  ;;  %5422 = vmatprep.mubr.msk.f32.mxu0 %vm62_vm0, %v4704_v44 }
  0xfa   :  { %5412 = vmatprep.subr.mxu0 %v6101_v3  ;;  %5397 = vmatpush3.msra.mxu1 %v4693_v11  ;;  %v4798_v11 = vld [vmem:[%s7076_s2 + $0x1f0] sm:$0xff] }
  0xfb   :  { %5413 = vmatpush3.msra.mxu0 %v6101_v3  ;;  %5398 = vmatprep.subr.mxu1 %v4692_v12 }
  0xfc   :  { %5414 = vmatprep.subr.mxu0 %v6110_v4  ;;  %5399 = vmatpush3.msra.mxu1 %v4692_v12 }
  0xfd   :  { %5415 = vmatpush3.msra.mxu0 %v6110_v4  ;;  %5428 = vmatprep.subr.mxu1 %v4719_v13 }
  0xfe   :  { %5416 = vmatprep.subr.mxu0 %v6119_v5 }
  0xff   :  { %5417 = vmatpush3.msra.mxu0 %v6119_v5 }
 0x100   :  { %5418 = vmatprep.subr.mxu0 %v6128_v6 }
 0x101   :  { %5419 = vmatpush3.msra.mxu0 %v6128_v6 }
 0x102   :  { %5420 = vmatprep.subr.mxu0 %v6137_v7 }
 0x103   :  { %5421 = vmatpush3.msra.mxu0 %v6137_v7 }
 0x104   :  { %5423 = vmatmul.mubr.msk.f32.vlgmr.msra.gmra.mxu0 %vm62_vm0, %v4705_v45  ;;  %5450 = vmatprep.subr.mxu0 %v6078_v0  ;;  %v4757_v45 = vld [vmem:[%s7076_s2 + $0x168] sm:$0xff] }
 0x105   :  { %5451 = vmatpush3.msra.mxu0 %v6078_v0  ;;  %5425 = vmatprep.mubr.msk.f32.mxu0 %vm62_vm0, %v4706_v46 }
 0x106   :  { %5452 = vmatprep.subr.mxu0 %v6083_v1 }
 0x107   :  { %5453 = vmatpush3.msra.mxu0 %v6083_v1 }
 0x108   :  { %5426 = vmatmul.mubr.msk.f32.gmra.mxu0 %vm62_vm0, %v4707_v47  ;;  %5454 = vmatprep.subr.mxu0 %v6092_v2  ;;  %v4756_v47 = vld [vmem:[%s7076_s2 + $0x160] sm:$0xff] }
 0x109   :  { %5455 = vmatpush3.msra.mxu0 %v6092_v2  ;;  %5466 = vmatprep.mubr.msk.f32.mxu0 %vm62_vm0, %v4724_v48  ;;  %v4755_v48 = vld [vmem:[%s7076_s2 + $0x158] sm:$0xff] }
 0x10a   :  { %5456 = vmatprep.subr.mxu0 %v6101_v3 }
 0x10b   :  { %5457 = vmatpush3.msra.mxu0 %v6101_v3 }
 0x10c   :  { %5458 = vmatprep.subr.mxu0 %v6110_v4 }
 0x10d   :  { %5459 = vmatpush3.msra.mxu0 %v6110_v4 }
 0x10e   :  { %5460 = vmatprep.subr.mxu0 %v6119_v5 }
 0x10f   :  { %5461 = vmatpush3.msra.mxu0 %v6119_v5 }
 0x110   :  { %5462 = vmatprep.subr.mxu0 %v6128_v6 }
 0x111   :  { %5463 = vmatpush3.msra.mxu0 %v6128_v6 }
 0x112   :  { %5464 = vmatprep.subr.mxu0 %v6137_v7 }
 0x113   :  { %5465 = vmatpush3.msra.mxu0 %v6137_v7 }
 0x114   :  { %5467 = vmatmul.mubr.msk.f32.vlgmr.msra.gmra.mxu0 %vm62_vm0, %v4725_v49  ;;  %5494 = vmatprep.subr.mxu0 %v6078_v0  ;;  %v4754_v49 = vld [vmem:[%s7076_s2 + $0x150] sm:$0xff] }
 0x115   :  { %5495 = vmatpush3.msra.mxu0 %v6078_v0  ;;  %5469 = vmatprep.mubr.msk.f32.mxu0 %vm62_vm0, %v4726_v50  ;;  %v4753_v50 = vld [vmem:[%s7076_s2 + $0x148] sm:$0xff] }
 0x116   :  { %5496 = vmatprep.subr.mxu0 %v6083_v1 }
 0x117   :  { %5497 = vmatpush3.msra.mxu0 %v6083_v1 }
 0x118   :  { %5470 = vmatmul.mubr.msk.f32.gmra.mxu0 %vm62_vm0, %v4727_v51  ;;  %5498 = vmatprep.subr.mxu0 %v6092_v2  ;;  %v4752_v51 = vld [vmem:[%s7076_s2 + $0x140] sm:$0xff] }
 0x119   :  { %5499 = vmatpush3.msra.mxu0 %v6092_v2  ;;  %5510 = vmatprep.mubr.msk.f32.mxu0 %vm62_vm0, %v4744_v52 }
 0x11a   :  { %5500 = vmatprep.subr.mxu0 %v6101_v3 }
 0x11b   :  { %5501 = vmatpush3.msra.mxu0 %v6101_v3 }
 0x11c   :  { %5502 = vmatprep.subr.mxu0 %v6110_v4 }
 0x11d   :  { %5503 = vmatpush3.msra.mxu0 %v6110_v4 }
 0x11e   :  { %5504 = vmatprep.subr.mxu0 %v6119_v5 }
 0x11f   :  { %5505 = vmatpush3.msra.mxu0 %v6119_v5 }
 0x120   :  { %5506 = vmatprep.subr.mxu0 %v6128_v6 }
 0x121   :  { %5507 = vmatpush3.msra.mxu0 %v6128_v6 }
 0x122   :  { %5508 = vmatprep.subr.mxu0 %v6137_v7 }
 0x123   :  { %5509 = vmatpush3.msra.mxu0 %v6137_v7 }
 0x124   :  { %5511 = vmatmul.mubr.msk.f32.vlgmr.msra.gmra.mxu0 %vm62_vm0, %v4745_v53  ;;  %5538 = vmatprep.subr.mxu0 %v6078_v0  ;;  %v4779_v53 = vld [vmem:[%s7076_s2 + $0x1b8] sm:$0xff] }
 0x125   :  { %5539 = vmatpush3.msra.mxu0 %v6078_v0  ;;  %5513 = vmatprep.mubr.msk.f32.mxu0 %vm62_vm0, %v4746_v54 }
 0x126   :  { %5540 = vmatprep.subr.mxu0 %v6083_v1 }
 0x127   :  { %5541 = vmatpush3.msra.mxu0 %v6083_v1 }
 0x128   :  { %5514 = vmatmul.mubr.msk.f32.gmra.mxu0 %vm62_vm0, %v4747_v55  ;;  %5542 = vmatprep.subr.mxu0 %v6092_v2  ;;  %v4778_v55 = vld [vmem:[%s7076_s2 + $0x1b0] sm:$0xff] }
 0x129   :  { %5543 = vmatpush3.msra.mxu0 %v6092_v2  ;;  %5554 = vmatprep.mubr.msk.f32.mxu0 %vm62_vm0, %v4764_v56 }
 0x12a   :  { %5544 = vmatprep.subr.mxu0 %v6101_v3 }
 0x12b   :  { %5545 = vmatpush3.msra.mxu0 %v6101_v3 }
 0x12c   :  { %5546 = vmatprep.subr.mxu0 %v6110_v4 }
 0x12d   :  { %5547 = vmatpush3.msra.mxu0 %v6110_v4 }
 0x12e   :  { %5548 = vmatprep.subr.mxu0 %v6119_v5 }
 0x12f   :  { %5549 = vmatpush3.msra.mxu0 %v6119_v5 }
 0x130   :  { %5550 = vmatprep.subr.mxu0 %v6128_v6 }
 0x131   :  { %5551 = vmatpush3.msra.mxu0 %v6128_v6 }
 0x132   :  { %5552 = vmatprep.subr.mxu0 %v6137_v7 }
 0x133   :  { %5553 = vmatpush3.msra.mxu0 %v6137_v7 }
 0x134   :  { %5555 = vmatmul.mubr.msk.f32.vlgmr.msra.gmra.mxu0 %vm62_vm0, %v4765_v62  ;;  %5582 = vmatprep.subr.mxu0 %v6078_v0  ;;  %v4773_v62 = vld [vmem:[%s7076_s2 + $0x188] sm:$0xff] }
 0x135   :  { %5583 = vmatpush3.msra.mxu0 %v6078_v0  ;;  %5557 = vmatprep.mubr.msk.f32.mxu0 %vm62_vm0, %v4766_v63  ;;  %v4772_v63 = vld [vmem:[%s7076_s2 + $0x180] sm:$0xff] }
 0x136   :  { %5584 = vmatprep.subr.mxu0 %v6083_v1 }
 0x137   :  { %5585 = vmatpush3.msra.mxu0 %v6083_v1 }
 0x138   :  { %5558 = vmatmul.mubr.msk.f32.gmra.mxu0 %vm62_vm0, %v4767_v9  ;;  %5586 = vmatprep.subr.mxu0 %v6092_v2  ;;  %v4799_v9 = vld [vmem:[%s7076_s2 + $0x1f8] sm:$0xff] }
 0x139   :  { %5587 = vmatpush3.msra.mxu0 %v6092_v2  ;;  %5598 = vmatprep.mubr.msk.f32.mxu0 %vm62_vm0, %v4784_v10 }
 0x13a   :  { %5588 = vmatprep.subr.mxu0 %v6101_v3 }
 0x13b   :  { %5589 = vmatpush3.msra.mxu0 %v6101_v3 }
 0x13c   :  { %5590 = vmatprep.subr.mxu0 %v6110_v4 }
 0x13d   :  { %5591 = vmatpush3.msra.mxu0 %v6110_v4 }
 0x13e   :  { %5592 = vmatprep.subr.mxu0 %v6119_v5 }
 0x13f   :  { %5593 = vmatpush3.msra.mxu0 %v6119_v5 }
 0x140   :  { %5594 = vmatprep.subr.mxu0 %v6128_v6 }
 0x141   :  { %5595 = vmatpush3.msra.mxu0 %v6128_v6 }
 0x142   :  { %5596 = vmatprep.subr.mxu0 %v6137_v7 }
 0x143   :  { %5597 = vmatpush3.msra.mxu0 %v6137_v7 }
 0x144   :  { %5599 = vmatmul.mubr.msk.f32.vlgmr.msra.gmra.mxu0 %vm62_vm0, %v4785_v14  ;;  %5626 = vmatprep.subr.mxu0 %v6078_v0 }
 0x145   :  { %5627 = vmatpush3.msra.mxu0 %v6078_v0  ;;  %5601 = vmatprep.mubr.msk.f32.mxu0 %vm62_vm0, %v4786_v15  ;;  %v4805_v0 = vld [vmem:[%s7075_s1 + $0x108] sm:$0xff]  ;;  %v4796_v15 = vld [vmem:[%s7076_s2 + $0x1e0] sm:$0xff] }
 0x146   :  { %5628 = vmatprep.subr.mxu0 %v6083_v1 }
 0x147   :  { %5629 = vmatpush3.msra.mxu0 %v6083_v1  ;;  %v4806_v1 = vld [vmem:[%s7075_s1 + $0x110] sm:$0xff] }
 0x148   :  { %5602 = vmatmul.mubr.msk.f32.gmra.mxu0 %vm62_vm0, %v4787_v16  ;;  %5630 = vmatprep.subr.mxu0 %v6092_v2  ;;  %v4795_v16 = vld [vmem:[%s7076_s2 + $0x1d8] sm:$0xff] }
 0x149   :  { %5631 = vmatpush3.msra.mxu0 %v6092_v2  ;;  %5642 = vmatprep.mubr.msk.f32.mxu0 %vm62_vm0, %v4804_v17  ;;  %v4807_v2 = vld [vmem:[%s7075_s1 + $0x118] sm:$0xf]  ;;  %v4794_v17 = vld [vmem:[%s7076_s2 + $0x1d0] sm:$0xff] }
 0x14a   :  { %5632 = vmatprep.subr.mxu0 %v6101_v3 }
 0x14b   :  { %5633 = vmatpush3.msra.mxu0 %v6101_v3 }
 0x14c   :  { %5634 = vmatprep.subr.mxu0 %v6110_v4 }
 0x14d   :  { %5635 = vmatpush3.msra.mxu0 %v6110_v4 }
 0x14e   :  { %5636 = vmatprep.subr.mxu0 %v6119_v5 }
 0x14f   :  { %5637 = vmatpush3.msra.mxu0 %v6119_v5 }
 0x150   :  { %5638 = vmatprep.subr.mxu0 %v6128_v6 }
 0x151   :  { %5639 = vmatpush3.msra.mxu0 %v6128_v6 }
 0x152   :  { %5640 = vmatprep.subr.mxu0 %v6137_v7 }
 0x153   :  { %5641 = vmatpush3.msra.mxu0 %v6137_v7 }
 0x154   :  { %5643 = vmatmul.mubr.msk.f32.vlgmr.msra.gmra.mxu0 %vm62_vm0, %v4805_v0  ;;  %v4793_v0 = vld [vmem:[%s7076_s2 + $0x1c8] sm:$0xff] }
 0x155   :  { %5645 = vmatprep.mubr.msk.f32.mxu0 %vm62_vm0, %v4806_v1  ;;  %v4792_v1 = vld [vmem:[%s7076_s2 + $0x1c0] sm:$0xff] }
 0x158   :  { %5646 = vmatmul.mubr.msk.f32.gmra.mxu0 %vm62_vm0, %v4807_v2 }
 0x1a4   :  { %v6486_v3 = vpop.f32.mrf.mxu0 }
 0x1a6   :  { %v6488_v4 = vpop.f32.mrf.mxu0 }
 0x1aa   :  { %v6490_v5 = vpop.f32.mrf.mxu0 }
 0x1ac   :  { %v6492_v6 = vpop.f32.mrf.mxu0 }
 0x1b4   :  { %v5380_v18 = vpop.f32.mrf.mxu0 }
 0x1b6   :  { %v556_v7 = vpop.f32.mrf.mxu0 }
 0x1b7   :  { %5400 = vmatprep.mubr.msk.f32.mxu1 %vm62_vm0, %v556_v7 }
 0x1b8   :  { %v5383_v20 = vpop.f32.mrf.mxu0  ;;  %5401 = vmatmul.mubr.msk.f32.vlgmr.msra.gmra.mxu1 %vm62_vm0, %v5380_v18  ;;  %v4819_v18 = vld [vmem:[%s7076_s2 + $0x238] sm:$0xff] }
 0x1b9   :  { %5429 = vmatpush3.msra.mxu1 %v4719_v13  ;;  %v4797_v13 = vld [vmem:[%s7076_s2 + $0x1e8] sm:$0xff] }
 0x1ba   :  { %v566_v22 = vpop.f32.mrf.mxu0  ;;  %5430 = vmatprep.subr.mxu1 %v4718_v19 }
 0x1bb   :  { %5403 = vmatprep.mubr.msk.f32.mxu1 %vm62_vm0, %v566_v22  ;;  %5431 = vmatpush3.msra.mxu1 %v4718_v19  ;;  %v4818_v19 = vld [vmem:[%s7076_s2 + $0x230] sm:$0xff] }
 0x1bc   :  { %5404 = vmatmul.mubr.msk.f32.gmra.mxu1 %vm62_vm0, %v5383_v20  ;;  %5432 = vmatprep.subr.mxu1 %v4717_v21 }
 0x1bd   :  { %5433 = vmatpush3.msra.mxu1 %v4717_v21  ;;  %v4817_v21 = vld [vmem:[%s7076_s2 + $0x228] sm:$0xff] }
 0x1be   :  { %5434 = vmatprep.subr.mxu1 %v4716_v23 }
 0x1bf   :  { %5435 = vmatpush3.msra.mxu1 %v4716_v23  ;;  %v4816_v23 = vld [vmem:[%s7076_s2 + $0x220] sm:$0xff] }
 0x1c0   :  { %5436 = vmatprep.subr.mxu1 %v4715_v24 }
 0x1c1   :  { %5437 = vmatpush3.msra.mxu1 %v4715_v24  ;;  %v4815_v24 = vld [vmem:[%s7076_s2 + $0x218] sm:$0xff] }
 0x1c2   :  { %5438 = vmatprep.subr.mxu1 %v4714_v25 }
 0x1c3   :  { %5439 = vmatpush3.msra.mxu1 %v4714_v25  ;;  %v4814_v25 = vld [vmem:[%s7076_s2 + $0x210] sm:$0xff] }
 0x1c4   :  { %v5424_v28 = vpop.f32.mrf.mxu0  ;;  %5440 = vmatprep.subr.mxu1 %v4713_v26 }
 0x1c5   :  { %5441 = vmatpush3.msra.mxu1 %v4713_v26  ;;  %v4813_v26 = vld [vmem:[%s7076_s2 + $0x208] sm:$0xff] }
 0x1c6   :  { %v768_v30 = vpop.f32.mrf.mxu0  ;;  %5442 = vmatprep.subr.mxu1 %v4712_v27 }
 0x1c7   :  { %5443 = vmatpush3.msra.mxu1 %v4712_v27  ;;  %5444 = vmatprep.mubr.msk.f32.mxu1 %vm62_vm0, %v768_v30  ;;  %v4812_v27 = vld [vmem:[%s7076_s2 + $0x200] sm:$0xff] }
 0x1c8   :  { %v5427_v32 = vpop.f32.mrf.mxu0  ;;  %5445 = vmatmul.mubr.msk.f32.vlgmr.msra.gmra.mxu1 %vm62_vm0, %v5424_v28  ;;  %5472 = vmatprep.subr.mxu1 %v4739_v29 }
 0x1c9   :  { %5473 = vmatpush3.msra.mxu1 %v4739_v29 }
 0x1ca   :  { %v778_v34 = vpop.f32.mrf.mxu0  ;;  %5474 = vmatprep.subr.mxu1 %v4738_v31 }
 0x1cb   :  { %5447 = vmatprep.mubr.msk.f32.mxu1 %vm62_vm0, %v778_v34  ;;  %5475 = vmatpush3.msra.mxu1 %v4738_v31  ;;  %v1977_v34 = vld [vmem:[%s7080_s6 + $0x28] sm:$0xff] }
 0x1cc   :  { %5448 = vmatmul.mubr.msk.f32.gmra.mxu1 %vm62_vm0, %v5427_v32  ;;  %5476 = vmatprep.subr.mxu1 %v4737_v33  ;;  %v6011_v32 = vmov 0.0  }
 0x1cd   :  { %5477 = vmatpush3.msra.mxu1 %v4737_v33  ;;  %5670 = vmatprep.subr.mxu0 %v6011_v32  ;;  %v1978_v33 = vld [vmem:[%s7080_s6 + $0x30] sm:$0xff] }
 0x1ce   :  { %5478 = vmatprep.subr.mxu1 %v4736_v35  ;;  %5671 = vmatpush3.msra.mxu0 %v1978_v33 }
 0x1cf   :  { %5479 = vmatpush3.msra.mxu1 %v4736_v35  ;;  %5672 = vmatprep.subr.mxu0 %v6011_v32  ;;  %v1976_v35 = vld [vmem:[%s7080_s6 + $0x20] sm:$0xff] }
 0x1d0   :  { %5480 = vmatprep.subr.mxu1 %v4735_v36  ;;  %5673 = vmatpush3.msra.mxu0 %v1977_v34 }
 0x1d1   :  { %5481 = vmatpush3.msra.mxu1 %v4735_v36  ;;  %5674 = vmatprep.subr.mxu0 %v6011_v32  ;;  %v1975_v36 = vld [vmem:[%s7080_s6 + $0x18] sm:$0xff] }
 0x1d2   :  { %5482 = vmatprep.subr.mxu1 %v4734_v37  ;;  %5675 = vmatpush3.msra.mxu0 %v1976_v35 }
 0x1d3   :  { %5483 = vmatpush3.msra.mxu1 %v4734_v37  ;;  %5676 = vmatprep.subr.mxu0 %v6011_v32  ;;  %v1974_v37 = vld [vmem:[%s7080_s6 + $0x10] sm:$0xff] }
 0x1d4   :  { %v5468_v40 = vpop.f32.mrf.mxu0  ;;  %5484 = vmatprep.subr.mxu1 %v4733_v38  ;;  %5677 = vmatpush3.msra.mxu0 %v1975_v36 }
 0x1d5   :  { %5485 = vmatpush3.msra.mxu1 %v4733_v38  ;;  %5678 = vmatprep.subr.mxu0 %v6011_v32  ;;  %v1973_v38 = vld [vmem:[%s7080_s6 + $0x8] sm:$0xff] }
 0x1d6   :  { %v980_v42 = vpop.f32.mrf.mxu0  ;;  %5486 = vmatprep.subr.mxu1 %v4732_v39  ;;  %5679 = vmatpush3.msra.mxu0 %v1974_v37 }
 0x1d7   :  { %5487 = vmatpush3.msra.mxu1 %v4732_v39  ;;  %5488 = vmatprep.mubr.msk.f32.mxu1 %vm62_vm0, %v980_v42  ;;  %v1972_v39 = vld [vmem:[%s7080_s6] sm:$0xff] }
 0x1d8   :  { %v5471_v44 = vpop.f32.mrf.mxu0  ;;  %5489 = vmatmul.mubr.msk.f32.vlgmr.msra.gmra.mxu1 %vm62_vm0, %v5468_v40  ;;  %5516 = vmatprep.subr.mxu1 %v4759_v41  ;;  %v5358_v40 = vpop.f32.mrf.mxu1 }
 0x1d9   :  { %5517 = vmatpush3.msra.mxu1 %v4759_v41  ;;  %5680 = vmatprep.subr.mxu0 %v6011_v32 }
 0x1da   :  { %v990_v46 = vpop.f32.mrf.mxu0  ;;  %5518 = vmatprep.subr.mxu1 %v4758_v43  ;;  %5681 = vmatpush3.msra.mxu0 %v1973_v38  ;;  %v454_v41 = vpop.f32.mrf.mxu1 }
 0x1db   :  { %5491 = vmatprep.mubr.msk.f32.mxu1 %vm62_vm0, %v990_v46  ;;  %5519 = vmatpush3.msra.mxu1 %v4758_v43 }
 0x1dc   :  { %5492 = vmatmul.mubr.msk.f32.gmra.mxu1 %vm62_vm0, %v5471_v44  ;;  %5520 = vmatprep.subr.mxu1 %v4757_v45  ;;  %v5361_v42 = vpop.f32.mrf.mxu1 }
 0x1dd   :  { %5521 = vmatpush3.msra.mxu1 %v4757_v45  ;;  %5682 = vmatprep.subr.mxu0 %v6011_v32 }
 0x1de   :  { %5522 = vmatprep.subr.mxu1 %v4756_v47  ;;  %5683 = vmatpush3.msra.mxu0 %v1972_v39  ;;  %v464_v43 = vpop.f32.mrf.mxu1 }
 0x1df   :  { %5523 = vmatpush3.msra.mxu1 %v4756_v47  ;;  %5684 = vmatprep.mubr.msk.f32.mxu0 %vm6012_vm1, %v6011_v32 }
 0x1e0   :  { %5524 = vmatprep.subr.mxu1 %v4755_v48 }
 0x1e1   :  { %5525 = vmatpush3.msra.mxu1 %v4755_v48 }
 0x1e2   :  { %5526 = vmatprep.subr.mxu1 %v4754_v49 }
 0x1e3   :  { %5527 = vmatpush3.msra.mxu1 %v4754_v49 }
 0x1e4   :  { %v5512_v52 = vpop.f32.mrf.mxu0  ;;  %5528 = vmatprep.subr.mxu1 %v4753_v50 }
 0x1e5   :  { %5529 = vmatpush3.msra.mxu1 %v4753_v50 }
 0x1e6   :  { %v1192_v54 = vpop.f32.mrf.mxu0  ;;  %5530 = vmatprep.subr.mxu1 %v4752_v51 }
 0x1e7   :  { %5531 = vmatpush3.msra.mxu1 %v4752_v51  ;;  %5532 = vmatprep.mubr.msk.f32.mxu1 %vm62_vm0, %v1192_v54 }
 0x1e8   :  { %v5515_v56 = vpop.f32.mrf.mxu0  ;;  %5533 = vmatmul.mubr.msk.f32.vlgmr.msra.gmra.mxu1 %vm62_vm0, %v5512_v52  ;;  %5560 = vmatprep.subr.mxu1 %v4779_v53 }
 0x1e9   :  { %5561 = vmatpush3.msra.mxu1 %v4779_v53 }
 0x1ea   :  { %v1202_v58 = vpop.f32.mrf.mxu0  ;;  %5562 = vmatprep.subr.mxu1 %v4778_v55 }
 0x1eb   :  { %5535 = vmatprep.mubr.msk.f32.mxu1 %vm62_vm0, %v1202_v58  ;;  %5563 = vmatpush3.msra.mxu1 %v4778_v55 }
 0x1ec   :  { %5536 = vmatmul.mubr.msk.f32.gmra.mxu1 %vm62_vm0, %v5515_v56  ;;  %5564 = vmatprep.subr.mxu1 %v4777_v57 }
 0x1ed   :  { %5565 = vmatpush3.msra.mxu1 %v4777_v57 }
 0x1ee   :  { %5566 = vmatprep.subr.mxu1 %v4776_v59 }
 0x1ef   :  { %5567 = vmatpush3.msra.mxu1 %v4776_v59 }
 0x1f0   :  { %5568 = vmatprep.subr.mxu1 %v4775_v60 }
 0x1f1   :  { %5569 = vmatpush3.msra.mxu1 %v4775_v60 }
 0x1f2   :  { %5570 = vmatprep.subr.mxu1 %v4774_v61 }
 0x1f3   :  { %5571 = vmatpush3.msra.mxu1 %v4774_v61 }
 0x1f4   :  { %v5556_v8 = vpop.f32.mrf.mxu0  ;;  %5572 = vmatprep.subr.mxu1 %v4773_v62 }
 0x1f5   :  { %5573 = vmatpush3.msra.mxu1 %v4773_v62 }
 0x1f6   :  { %v1404_v10 = vpop.f32.mrf.mxu0  ;;  %5574 = vmatprep.subr.mxu1 %v4772_v63 }
 0x1f7   :  { %5575 = vmatpush3.msra.mxu1 %v4772_v63  ;;  %5576 = vmatprep.mubr.msk.f32.mxu1 %vm62_vm0, %v1404_v10  ;;  %v455_v10 = vadd.f32 %v454_v41, %v6488_v4 }
 0x1f8   :  { %v5559_v12 = vpop.f32.mrf.mxu0  ;;  %5577 = vmatmul.mubr.msk.f32.vlgmr.msra.gmra.mxu1 %vm62_vm0, %v5556_v8  ;;  %5604 = vmatprep.subr.mxu1 %v4799_v9 }
 0x1f9   :  { %5605 = vmatpush3.msra.mxu1 %v4799_v9  ;;  %v460_v9 = vadd.f32 %v5358_v40, %v6486_v3 }
 0x1fa   :  { %v1414_v14 = vpop.f32.mrf.mxu0  ;;  %5606 = vmatprep.subr.mxu1 %v4798_v11 }
 0x1fb   :  { %5579 = vmatprep.mubr.msk.f32.mxu1 %vm62_vm0, %v1414_v14  ;;  %5607 = vmatpush3.msra.mxu1 %v4798_v11 }
 0x1fc   :  { %5580 = vmatmul.mubr.msk.f32.gmra.mxu1 %vm62_vm0, %v5559_v12  ;;  %5608 = vmatprep.subr.mxu1 %v4797_v13 }
 0x1fd   :  { %5609 = vmatpush3.msra.mxu1 %v4797_v13  ;;  %v470_v13 = vadd.f32 %v5361_v42, %v6490_v5 }
 0x1fe   :  { %5610 = vmatprep.subr.mxu1 %v4796_v15 }
 0x1ff   :  { %5611 = vmatpush3.msra.mxu1 %v4796_v15 }
 0x200   :  { %5612 = vmatprep.subr.mxu1 %v4795_v16 }
 0x201   :  { %5613 = vmatpush3.msra.mxu1 %v4795_v16  ;;  %v465_v16 = vadd.f32 %v464_v43, %v6492_v6  ;;  %v4824_v6 = vld [vmem:[%s7077_s3] ss:$0 sm:$0xff] }
 0x202   :  { %5614 = vmatprep.subr.mxu1 %v4794_v17 }
 0x203   :  { %5615 = vmatpush3.msra.mxu1 %v4794_v17 }
 0x204   :  { %v5600_v2 = vpop.f32.mrf.mxu0  ;;  %5616 = vmatprep.subr.mxu1 %v4793_v0 }
 0x205   :  { %5617 = vmatpush3.msra.mxu1 %v4793_v0 }
 0x206   :  { %v1616_v7 = vpop.f32.mrf.mxu0  ;;  %5618 = vmatprep.subr.mxu1 %v4792_v1 }
 0x207   :  { %5619 = vmatpush3.msra.mxu1 %v4792_v1  ;;  %5620 = vmatprep.mubr.msk.f32.mxu1 %vm62_vm0, %v1616_v7 }
 0x208   :  { %v5603_v20 = vpop.f32.mrf.mxu0  ;;  %5621 = vmatmul.mubr.msk.f32.vlgmr.msra.gmra.mxu1 %vm62_vm0, %v5600_v2  ;;  %5648 = vmatprep.subr.mxu1 %v4819_v18 }
 0x209   :  { %5649 = vmatpush3.msra.mxu1 %v4819_v18 }
 0x20a   :  { %v1626_v22 = vpop.f32.mrf.mxu0  ;;  %5650 = vmatprep.subr.mxu1 %v4818_v19 }
 0x20b   :  { %5623 = vmatprep.mubr.msk.f32.mxu1 %vm62_vm0, %v1626_v22  ;;  %5651 = vmatpush3.msra.mxu1 %v4818_v19 }
 0x20c   :  { %5624 = vmatmul.mubr.msk.f32.gmra.mxu1 %vm62_vm0, %v5603_v20  ;;  %5652 = vmatprep.subr.mxu1 %v4817_v21 }
 0x20d   :  { %5653 = vmatpush3.msra.mxu1 %v4817_v21 }
 0x20e   :  { %5654 = vmatprep.subr.mxu1 %v4816_v23 }
 0x20f   :  { %5655 = vmatpush3.msra.mxu1 %v4816_v23 }
 0x210   :  { %5656 = vmatprep.subr.mxu1 %v4815_v24 }
 0x211   :  { %5657 = vmatpush3.msra.mxu1 %v4815_v24 }
 0x212   :  { %5658 = vmatprep.subr.mxu1 %v4814_v25 }
 0x213   :  { %5659 = vmatpush3.msra.mxu1 %v4814_v25 }
 0x214   :  { %v5644_v28 = vpop.f32.mrf.mxu0  ;;  %5660 = vmatprep.subr.mxu1 %v4813_v26 }
 0x215   :  { %5661 = vmatpush3.msra.mxu1 %v4813_v26 }
 0x216   :  { %v1828_v29 = vpop.f32.mrf.mxu0  ;;  %5662 = vmatprep.subr.mxu1 %v4812_v27 }
 0x217   :  { %5663 = vmatpush3.msra.mxu1 %v4812_v27  ;;  %5664 = vmatprep.mubr.msk.f32.mxu1 %vm62_vm0, %v1828_v29 }
 0x218   :  { %v5647_v30 = vpop.f32.mrf.mxu0  ;;  %5665 = vmatmul.mubr.msk.f32.vlgmr.msra.gmra.mxu1 %vm62_vm0, %v5644_v28  ;;  %5687 = vmatprep.subr.mxu1 %v6011_v32 }
 0x219   :  { %5688 = vmatpush3.msra.mxu1 %v1978_v33 }
 0x21a   :  { %v1838_v31 = vpop.f32.mrf.mxu0  ;;  %5689 = vmatprep.subr.mxu1 %v6011_v32 }
 0x21b   :  { %5667 = vmatprep.mubr.msk.f32.mxu1 %vm62_vm0, %v1838_v31  ;;  %5690 = vmatpush3.msra.mxu1 %v1977_v34 }
 0x21c   :  { %5668 = vmatmul.mubr.msk.f32.gmra.mxu1 %vm62_vm0, %v5647_v30  ;;  %5691 = vmatprep.subr.mxu1 %v6011_v32 }
 0x21d   :  { %5692 = vmatpush3.msra.mxu1 %v1976_v35  ;;  %5701 = vmatprep.mubr.msk.f32.mxu1 %vm6012_vm1, %v6011_v32 }
 0x21e   :  { %5693 = vmatprep.subr.mxu1 %v6011_v32 }
 0x21f   :  { %5694 = vmatpush3.msra.mxu1 %v1975_v36 }
 0x220   :  { %5695 = vmatprep.subr.mxu1 %v6011_v32 }
 0x221   :  { %5696 = vmatpush3.msra.mxu1 %v1974_v37 }
 0x222   :  { %5697 = vmatprep.subr.mxu1 %v6011_v32 }
 0x223   :  { %5698 = vmatpush3.msra.mxu1 %v1973_v38 }
 0x224   :  { %5699 = vmatprep.subr.mxu1 %v6011_v32 }
 0x225   :  { %5700 = vmatpush3.msra.mxu1 %v1972_v39 }
 0x278   :  { %v5402_v44 = vpop.f32.mrf.mxu1 }
 0x279   :  { %v682_v11 = vadd.f32 %v5402_v44, %v460_v9 }
 0x27a   :  { %v662_v45 = vpop.f32.mrf.mxu1 }
 0x27b   :  { %v681_v14 = vadd.f32 %v662_v45, %v455_v10 }
 0x27c   :  { %v5405_v46 = vpop.f32.mrf.mxu1 }
 0x27d   :  { %v684_v17 = vadd.f32 %v5405_v46, %v470_v13 }
 0x27e   :  { %v672_v47 = vpop.f32.mrf.mxu1 }
 0x27f   :  { %v683_v18 = vadd.f32 %v672_v47, %v465_v16 }
 0x288   :  { %v5446_v48 = vpop.f32.mrf.mxu1 }
 0x289   :  { %v894_v15 = vadd.f32 %v5446_v48, %v682_v11 }
 0x28a   :  { %v874_v49 = vpop.f32.mrf.mxu1 }
 0x28b   :  { %v893_v0 = vadd.f32 %v874_v49, %v681_v14 }
 0x28c   :  { %v5449_v50 = vpop.f32.mrf.mxu1 }
 0x28d   :  { %v896_v7 = vadd.f32 %v5449_v50, %v684_v17 }
 0x28e   :  { %v884_v51 = vpop.f32.mrf.mxu1 }
 0x28f   :  { %v895_v21 = vadd.f32 %v884_v51, %v683_v18 }
 0x298   :  { %v5490_v52 = vpop.f32.mrf.mxu1 }
 0x299   :  { %v1106_v1 = vadd.f32 %v5490_v52, %v894_v15 }
 0x29a   :  { %v1086_v53 = vpop.f32.mrf.mxu1 }
 0x29b   :  { %v1105_v19 = vadd.f32 %v1086_v53, %v893_v0 }
 0x29c   :  { %v5493_v54 = vpop.f32.mrf.mxu1 }
 0x29d   :  { %v1108_v3 = vadd.f32 %v5493_v54, %v896_v7 }
 0x29e   :  { %v1096_v55 = vpop.f32.mrf.mxu1 }
 0x29f   :  { %v1107_v24 = vadd.f32 %v1096_v55, %v895_v21 }
 0x2a8   :  { %v5534_v56 = vpop.f32.mrf.mxu1 }
 0x2a9   :  { %v1318_v20 = vadd.f32 %v5534_v56, %v1106_v1 }
 0x2aa   :  { %v1298_v57 = vpop.f32.mrf.mxu1 }
 0x2ab   :  { %v1317_v22 = vadd.f32 %v1298_v57, %v1105_v19 }
 0x2ac   :  { %v5537_v58 = vpop.f32.mrf.mxu1 }
 0x2ad   :  { %v1320_v25 = vadd.f32 %v5537_v58, %v1108_v3 }
 0x2ae   :  { %v1308_v59 = vpop.f32.mrf.mxu1 }
 0x2af   :  { %v1319_v28 = vadd.f32 %v1308_v59, %v1107_v24 }
 0x2b8   :  { %v5578_v60 = vpop.f32.mrf.mxu1 }
 0x2b9   :  { %v1530_v4 = vadd.f32 %v5578_v60, %v1318_v20 }
 0x2ba   :  { %v1510_v61 = vpop.f32.mrf.mxu1 }
 0x2bb   :  { %v1529_v5 = vadd.f32 %v1510_v61, %v1317_v22 }
 0x2bc   :  { %v5581_v62 = vpop.f32.mrf.mxu1 }
 0x2bd   :  { %v1532_v29 = vadd.f32 %v5581_v62, %v1320_v25 }
 0x2be   :  { %v1520_v63 = vpop.f32.mrf.mxu1 }
 0x2bf   :  { %v1531_v34 = vadd.f32 %v1520_v63, %v1319_v28  ;;  %v2067_v63 = vlaneseq }
 0x2c8   :  { %v5622_v8 = vpop.f32.mrf.mxu1 }
 0x2c9   :  { %v1742_v26 = vadd.f32 %v5622_v8, %v1530_v4  ;;  %v6712_v8 = vshrl.u32 %v2067_v63, 7  ;;  %v2388_v63 = vld [vmem:[#allocation2 + $0xd0] sm:$0xff] }
 0x2ca   :  { %v1722_v12 = vpop.f32.mrf.mxu1 }
 0x2cb   :  { %v1741_v30 = vadd.f32 %v1722_v12, %v1529_v5  ;;  %v6715_v9 = vsub.s32 0, %v6712_v8 }
 0x2cc   :  { %v5625_v2 = vpop.f32.mrf.mxu1 }
 0x2cd   :  { %v1744_v35 = vadd.f32 %v5625_v2, %v1532_v29 }
 0x2ce   :  { %v1732_v23 = vpop.f32.mrf.mxu1 }
 0x2cf   :  { %v1743_v39 = vadd.f32 %v1732_v23, %v1531_v34 }
 0x2d8   :  { %v5666_v27 = vpop.f32.mrf.mxu1 }
 0x2d9   :  { %v1954_v31 = vadd.f32 %v5666_v27, %v1742_v26  ;;  %v4831_v27 = vld [vmem:[%s7081_s7 + $0x10] sm:$0xff] }
 0x2da   :  { %v1934_v33 = vpop.f32.mrf.mxu1 }
 0x2db   :  { %v1965_v36 = vadd.f32 %v4824_v6, %v1954_v31  ;;  %v1953_v37 = vadd.f32 %v1934_v33, %v1741_v30  ;;  %v2092_v31 = vld [vmem:[%s7078_s4] sm:$0x1] }
 0x2dc   :  { %v5669_v38 = vpop.f32.mrf.mxu1 }
 0x2dd   :  { %v1964_v40 = vadd.f32 %v4824_v6, %v1953_v37  ;;  %v1956_v41 = vadd.f32 %v5669_v38, %v1744_v35  ;;  %v1969_v43 = vmax.f32 %v1965_v36, 0.0  ;;  %v4827_v36 = vld [vmem:[%s7079_s5] ss:$0 sm:$0xff] }
 0x2de   :  { %v1944_v42 = vpop.f32.mrf.mxu1 }
 0x2df   :  { %v1968_v44 = vmax.f32 %v1964_v40, 0.0  ;;  %v1967_v45 = vadd.f32 %v4824_v6, %v1956_v41  ;;  %v1955_v46 = vadd.f32 %v1944_v42, %v1743_v39  ;;  %v1981_v49 = vsel %vm1979_vm2, %v1969_v43, 0.0 }
 0x2e1   :  { %v1980_v47 = vsel %vm1979_vm2, %v1968_v44, 0.0  ;;  %v1966_v48 = vadd.f32 %v4824_v6, %v1955_v46  ;;  %v1971_v50 = vmax.f32 %v1967_v45, 0.0  ;;  %v2189_v6 = vld [vmem:[%s7081_s7] sm:$0xff]  ;;  %v4832_v45 = vld [vmem:[%s7081_s7 + $0x18] sm:$0xf] }
 0x2e2   :  { %v1982_v52 = vadd.f32 %v1981_v49, %v1980_v47  ;;  %v2190_v46 = vld [vmem:[%s7081_s7 + $0x8] sm:$0xf]  ;;  %v2402_v47 = vld [vmem:[#allocation2 + $0x140] sm:$0xff]  ;;  %v2401_v49 = vld [vmem:[#allocation2 + $0x138] sm:$0xff] }
 0x2e3   :  { %v1970_v51 = vmax.f32 %v1966_v48, 0.0  ;;  %v1986_v55 = vsel %vm1985_vm3, %v1971_v50, 0.0  ;;  %v2403_v48 = vld [vmem:[#allocation2 + $0x148] sm:$0xff] }
 0x2e5   :  { %v1983_v53 = vsel %vm1979_vm2, %v1970_v51, 0.0 }
 0x2e6   :  { %v1984_v54 = vadd.f32 %v1983_v53, %v1982_v52  ;;  %v2398_v52 = vld [vmem:[#allocation2 + $0x120] sm:$0xff]  ;;  %v2396_v53 = vld [vmem:[#allocation2 + $0x110] sm:$0xff] }
 0x2e8   :  { %v1987_v56 = vadd.f32 %v1986_v55, %v1984_v54  ;;  %v2397_v54 = vld [vmem:[#allocation2 + $0x118] sm:$0xff]  ;;  %v2395_v55 = vld [vmem:[#allocation2 + $0x108] sm:$0xff] }
 0x2ea   :  { %v1988_v57 = vrot.slane %v1987_v56, 4 }
 0x2ec   :  { %v1989_v58 = vadd.f32 %v1988_v57, %v1987_v56  ;;  %v2393_v56 = vld [vmem:[#allocation2 + $0xf8] sm:$0xff]  ;;  %v2394_v57 = vld [vmem:[#allocation2 + $0x100] sm:$0xff] }
 0x2ee   :  { %v1990_v59 = vrot.slane %v1989_v58, 2 }
 0x2f0   :  { %v1991_v60 = vadd.f32 %v1990_v59, %v1989_v58  ;;  %v2392_v58 = vld [vmem:[#allocation2 + $0xf0] sm:$0xff]  ;;  %v2390_v59 = vld [vmem:[#allocation2 + $0xe0] sm:$0xff] }
 0x2f2   :  { %v1992_v61 = vrot.slane %v1991_v60, 1 }
 0x2f4   :  { %v1993_v62 = vadd.f32 %v1992_v61, %v1991_v60  ;;  %v2391_v60 = vld [vmem:[#allocation2 + $0xe8] sm:$0xff]  ;;  %v2389_v61 = vld [vmem:[#allocation2 + $0xd8] sm:$0xff] }
 0x2f6   :  { %5685 = vmatmul.mubr.msk.f32.vlgmr.msra.gmra.mxu0 %vm1979_vm2, %v1993_v62  ;;  %v2387_v62 = vld [vmem:[#allocation2 + $0xc8] sm:$0xff] }
 0x2f7   :  { %5712 = vmatprep.mubr.msk.f32.mxu0 %vm2191_vm4, %v2189_v6  ;;  %v2278_v6 = vld [vmem:[#allocation2 + $0x8] sm:$0xff] }
 0x3b6   :  { %v2063_v10 = vpop.f32.mrf.mxu0 }
 0x3b7   :  { %v2070_v11 = vrot.slane %v2063_v10, %v6715_v9  ;;  %v2386_v10 = vld [vmem:[#allocation2 + $0xc0] sm:$0xff] }
 0x3b8   :  { %v5686_v12 = vpop.f32.mrf.mxu0 }
 0x3b9   :  { %v2071_v13 = vsub.f32 %v1968_v44, %v2070_v11  ;;  %v2072_v14 = vsub.f32 %v1969_v43, %v2070_v11  ;;  %v2073_v15 = vsub.f32 %v1970_v51, %v2070_v11  ;;  %v2074_v16 = vsub.f32 %v1971_v50, %v2070_v11  ;;  %v2399_v50 = vld [vmem:[#allocation2 + $0x128] sm:$0xff]  ;;  %v2400_v51 = vld [vmem:[#allocation2 + $0x130] sm:$0xff] }
 0x3ba   :  { %v2384_v11 = vld [vmem:[#allocation2 + $0xb0] sm:$0xff]  ;;  %v2383_v12 = vld [vmem:[#allocation2 + $0xa8] sm:$0xff] }
 0x3bb   :  { %v2075_v17 = vmul.f32 %v2071_v13, %v2071_v13  ;;  %v2076_v0 = vmul.f32 %v2072_v14, %v2072_v14  ;;  %v2077_v1 = vmul.f32 %v2073_v15, %v2073_v15  ;;  %v2078_v2 = vmul.f32 %v2074_v16, %v2074_v16 }
 0x3bd   :  { %v2079_v18 = vsel %vm1979_vm2, %v2075_v17, 0.0  ;;  %v2080_v7 = vsel %vm1979_vm2, %v2076_v0, 0.0  ;;  %v2082_v20 = vsel %vm1979_vm2, %v2077_v1, 0.0  ;;  %v2084_v3 = vsel %vm1985_vm3, %v2078_v2, 0.0  ;;  %v2295_v17 = vld [vmem:[#allocation2 + $0x90] sm:$0xff]  ;;  %v2293_v1 = vld [vmem:[#allocation2 + $0x80] sm:$0xff] }
 0x3be   :  { %v2081_v19 = vadd.f32 %v2080_v7, %v2079_v18  ;;  %v2292_v2 = vld [vmem:[#allocation2 + $0x78] sm:$0xff]  ;;  %v2294_v18 = vld [vmem:[#allocation2 + $0x88] sm:$0xff] }
 0x3bf   :  { %v2290_v7 = vld [vmem:[#allocation2 + $0x68] sm:$0xff] }
 0x3c0   :  { %v2083_v21 = vadd.f32 %v2082_v20, %v2081_v19  ;;  %v2289_v19 = vld [vmem:[#allocation2 + $0x60] sm:$0xff]  ;;  %v2291_v20 = vld [vmem:[#allocation2 + $0x70] sm:$0xff] }
 0x3c2   :  { %v2085_v22 = vadd.f32 %v2084_v3, %v2083_v21  ;;  %v2287_v21 = vld [vmem:[#allocation2 + $0x50] sm:$0xff]  ;;  %v2286_v3 = vld [vmem:[#allocation2 + $0x48] sm:$0xff] }
 0x3c4   :  { %v2086_v4 = vrot.slane %v2085_v22, 4 }
 0x3c6   :  { %v2087_v23 = vadd.f32 %v2086_v4, %v2085_v22  ;;  %v2288_v22 = vld [vmem:[#allocation2 + $0x58] sm:$0xff] }
 0x3c7   :  { %v2284_v4 = vld [vmem:[#allocation2 + $0x38] sm:$0xff] }
 0x3c8   :  { %v2088_v24 = vrot.slane %v2087_v23, 2 }
 0x3ca   :  { %v2089_v25 = vadd.f32 %v2088_v24, %v2087_v23  ;;  %v2283_v23 = vld [vmem:[#allocation2 + $0x30] sm:$0xff]  ;;  %v2285_v24 = vld [vmem:[#allocation2 + $0x40] sm:$0xff] }
 0x3cc   :  { %v2090_v5 = vrot.slane %v2089_v25, 1 }
 0x3ce   :  { %v2091_v26 = vadd.f32 %v2090_v5, %v2089_v25  ;;  %v2281_v5 = vld [vmem:[#allocation2 + $0x20] sm:$0xff] }
 0x3d0   :  { %5702 = vmatmul.mubr.msk.f32.vlgmr.msra.gmra.mxu1 %vm1979_vm2, %v2091_v26  ;;  %v2280_v26 = vld [vmem:[#allocation2 + $0x18] sm:$0xff] }
 0x3d1   :  { %5723 = vmatprep.mubr.msk.f32.mxu1 %vm2191_vm4, %v4831_v27  ;;  %v2282_v27 = vld [vmem:[#allocation2 + $0x28] sm:$0xff] }
 0x490   :  { %v2162_v28 = vpop.f32.mrf.mxu1 }
 0x491   :  { %v2163_v29 = vadd.f32 1e-05, %v2162_v28  ;;  %v2277_v28 = vld [vmem:[#allocation2] sm:$0xff] }
 0x492   :  { %v5703_v30 = vpop.f32.mrf.mxu1 }
 0x493   :  { %5962 = vrsqrt.f32 %v2163_v29  ;;  %v2279_v30 = vld [vmem:[#allocation2 + $0x10] sm:$0xff] }
 0x4a0   :  { %v5963_v33 = vpop.eup %5962 }
 0x4a1   :  { %v2167_v34 = vmul.f32 %v5963_v33, %v2092_v31  ;;  %v2824_v31 = vld [vmem:[#allocation2 + $0x1e8] sm:$0xff]  ;;  %v2823_v33 = vld [vmem:[#allocation2 + $0x1e0] sm:$0xff] }
 0x4a3   :  { %v2172_v35 = vrot.slane %v2167_v34, %v6715_v9  ;;  %v2821_v34 = vld [vmem:[#allocation2 + $0x1d0] sm:$0xff] }
 0x4a5   :  { %v2176_v37 = vmul.f32 %v2172_v35, %v2073_v15  ;;  %v2177_v38 = vmul.f32 %v2172_v35, %v2074_v16  ;;  %v2175_v39 = vmul.f32 %v2172_v35, %v2072_v14  ;;  %v2174_v41 = vmul.f32 %v2172_v35, %v2071_v13  ;;  %v2385_v13 = vld [vmem:[#allocation2 + $0xb8] sm:$0xff]  ;;  %v2297_v15 = vld [vmem:[#allocation2 + $0xa0] sm:$0xff]  ;;  %v2820_v35 = vld [vmem:[#allocation2 + $0x1c8] sm:$0xff] }
 0x4a6   :  { %v2296_v14 = vld [vmem:[#allocation2 + $0x98] sm:$0xff] }
 0x4a7   :  { %v6738_v40 = vadd.f32 %v4827_v36, %v2177_v38  ;;  %v6740_v42 = vadd.f32 %v4827_v36, %v2176_v37  ;;  %v6750_v43 = vadd.f32 %v4827_v36, %v2175_v39  ;;  %v6756_v44 = vadd.f32 %v4827_v36, %v2174_v41  ;;  %v2818_v36 = vld [vmem:[#allocation2 + $0x1b8] sm:$0xff]  ;;  %v2817_v37 = vld [vmem:[#allocation2 + $0x1b0] sm:$0xff]  ;;  %v4844_v38 = vld [vmem:[%s7081_s7 + $0x20] sm:$0xff] }
 0x4a8   :  { %v2815_v39 = vld [vmem:[#allocation2 + $0x1a0] sm:$0xff]  ;;  %v4845_v41 = vld [vmem:[%s7081_s7 + $0x28] sm:$0xf] }
 0x4a9   :  { %5704 = vmatprep.subr.msk.mxu0 %vm2198_vm5, %v6738_v40  ;;  %5715 = vmatprep.subr.msk.mxu1 %vm2198_vm5, %v6738_v40 }
 0x4aa   :  { %5705 = vmatpush3.msk.msra.mxu0 %vm2198_vm5, %v6738_v40  ;;  %5716 = vmatpush3.msk.msra.mxu1 %vm2198_vm5, %v6738_v40 }
 0x4ab   :  { %5706 = vmatprep.subr.mxu0 %v6740_v42  ;;  %5717 = vmatprep.subr.mxu1 %v6740_v42 }
 0x4ac   :  { %5707 = vmatpush3.msra.mxu0 %v6740_v42  ;;  %5718 = vmatpush3.msra.mxu1 %v6740_v42 }
 0x4ad   :  { %5708 = vmatprep.subr.mxu0 %v6750_v43  ;;  %5719 = vmatprep.subr.mxu1 %v6750_v43 }
 0x4ae   :  { %5709 = vmatpush3.msra.mxu0 %v6750_v43  ;;  %5720 = vmatpush3.msra.mxu1 %v6750_v43 }
 0x4af   :  { %5710 = vmatprep.subr.mxu0 %v6756_v44  ;;  %5721 = vmatprep.subr.mxu1 %v6756_v44 }
 0x4b0   :  { %5711 = vmatpush3.msra.mxu0 %v6756_v44  ;;  %5722 = vmatpush3.msra.mxu1 %v6756_v44 }
 0x4b1   :  { %5724 = vmatmul.mubr.msk.f32.vlgmr.msra.gmra.mxu1 %vm2191_vm4, %v4832_v45  ;;  %5713 = vmatmul.mubr.msk.f32.vlgmr.msra.gmra.mxu0 %vm2191_vm4, %v2190_v46  ;;  %v2814_v45 = vld [vmem:[#allocation2 + $0x198] sm:$0xff]  ;;  %v2812_v46 = vld [vmem:[#allocation2 + $0x188] sm:$0xff] }
 0x4b2   :  { %2428 = vmatprep.subr.mxu0 %v2402_v47  ;;  %5726 = vmatprep.subr.mxu1 %v2403_v48  ;;  %v2811_v47 = vld [vmem:[#allocation2 + $0x180] sm:$0xff] }
 0x4b3   :  { %2429 = vmatpush1.msra.mxu0 %v2401_v49  ;;  %5727 = vmatpush3.msra.mxu1 %v2403_v48  ;;  %v2809_v48 = vld [vmem:[#allocation2 + $0x170] sm:$0xff]  ;;  %v2808_v49 = vld [vmem:[#allocation2 + $0x168] sm:$0xff] }
 0x4b4   :  { %2430 = vmatprep.subr.mxu0 %v2399_v50  ;;  %5728 = vmatprep.subr.mxu1 %v2400_v51  ;;  %v2806_v50 = vld [vmem:[#allocation2 + $0x158] sm:$0xff] }
 0x4b5   :  { %2431 = vmatpush1.msra.mxu0 %v2398_v52  ;;  %5729 = vmatpush3.msra.mxu1 %v2400_v51  ;;  %v2805_v51 = vld [vmem:[#allocation2 + $0x150] sm:$0xff] }
 0x4b6   :  { %2432 = vmatprep.subr.mxu0 %v2396_v53  ;;  %5730 = vmatprep.subr.mxu1 %v2397_v54  ;;  %v2825_v52 = vld [vmem:[#allocation2 + $0x1f0] sm:$0xff]  ;;  %v2822_v53 = vld [vmem:[#allocation2 + $0x1d8] sm:$0xff] }
 0x4b7   :  { %2433 = vmatpush1.msra.mxu0 %v2395_v55  ;;  %5731 = vmatpush3.msra.mxu1 %v2397_v54  ;;  %v2819_v54 = vld [vmem:[#allocation2 + $0x1c0] sm:$0xff]  ;;  %v2816_v55 = vld [vmem:[#allocation2 + $0x1a8] sm:$0xff] }
 0x4b8   :  { %2434 = vmatprep.subr.mxu0 %v2393_v56  ;;  %5732 = vmatprep.subr.mxu1 %v2394_v57  ;;  %v2813_v56 = vld [vmem:[#allocation2 + $0x190] sm:$0xff] }
 0x4b9   :  { %2435 = vmatpush1.msra.mxu0 %v2392_v58  ;;  %5733 = vmatpush3.msra.mxu1 %v2394_v57  ;;  %v2810_v57 = vld [vmem:[#allocation2 + $0x178] sm:$0xff]  ;;  %v2807_v58 = vld [vmem:[#allocation2 + $0x160] sm:$0xff] }
 0x4ba   :  { %2436 = vmatprep.subr.mxu0 %v2390_v59  ;;  %5734 = vmatprep.subr.mxu1 %v2391_v60  ;;  %v3094_v59 = vld [vmem:[#allocation2 + $0x290] sm:$0xff] }
 0x4bb   :  { %2437 = vmatpush1.msra.mxu0 %v2389_v61  ;;  %5735 = vmatpush3.msra.mxu1 %v2391_v60 }
 0x4bc   :  { %2438 = vmatprep.subr.mxu0 %v2387_v62  ;;  %5736 = vmatprep.subr.mxu1 %v2388_v63 }
 0x4bd   :  { %2439 = vmatpush1.msra.mxu0 %v2386_v10  ;;  %5737 = vmatpush3.msra.mxu1 %v2388_v63 }
 0x4be   :  { %2474 = vmatprep.mubr.f32.mxu0 %v6011_v32  ;;  %2440 = vmatprep.subr.mxu0 %v2384_v11 }
 0x4bf   :  { %2441 = vmatpush1.msra.mxu0 %v2383_v12  ;;  %5738 = vmatprep.subr.mxu1 %v2385_v13 }
 0x4c0   :  { %5739 = vmatpush3.msra.mxu1 %v2385_v13  ;;  %2586 = vmatprep.subr.mxu0 %v2296_v14 }
 0x4c1   :  { %5743 = vmatprep.subr.mxu1 %v2297_v15 }
 0x571   :  { %v5725_v16 = vpop.f32.mrf.mxu1  ;;  %v5714_v25 = vpop.f32.mrf.mxu0 }
 0x573   :  { %v2373_v0 = vpop.f32.mrf.mxu1  ;;  %v2268_v29 = vpop.f32.mrf.mxu0 }
 0x574   :  { %4836 = vmatmul.mubr.msk.f32.vlgmr.msra.gmra.mxu0 %vm1979_vm2, %v2373_v0  ;;  %5740 = vmatprep.mubr.msk.f32.mxu1 %vm1979_vm2, %v2373_v0 }
 0x575   :  { %2587 = vmatpush1.msra.mxu0 %v2295_v17  ;;  %5741 = vmatmul.mubr.msk.f32.vlgmr.msra.gmra.mxu1 %vm1979_vm2, %v5725_v16 }
 0x576   :  { %2588 = vmatprep.subr.mxu0 %v2293_v1  ;;  %5744 = vmatpush3.msra.mxu1 %v2297_v15 }
 0x577   :  { %2589 = vmatpush1.msra.mxu0 %v2292_v2  ;;  %5745 = vmatprep.subr.mxu1 %v2294_v18 }
 0x578   :  { %2480 = vmatprep.mubr.f32.mxu0 %v6011_v32  ;;  %2590 = vmatprep.subr.mxu0 %v2290_v7 }
 0x579   :  { %5746 = vmatpush3.msra.mxu1 %v2294_v18  ;;  %4837 = vmatmul.mubr.msk.f32.gmra.mxu0 %vm1979_vm2, %v5725_v16 }
 0x57a   :  { %2591 = vmatpush1.msra.mxu0 %v2289_v19  ;;  %5747 = vmatprep.subr.mxu1 %v2291_v20 }
 0x57b   :  { %2592 = vmatprep.subr.mxu0 %v2287_v21  ;;  %5748 = vmatpush3.msra.mxu1 %v2291_v20  ;;  %v3093_v20 = vld [vmem:[#allocation2 + $0x288] sm:$0xff]  ;;  %v3091_v21 = vld [vmem:[#allocation2 + $0x278] sm:$0xff] }
 0x57c   :  { %2593 = vmatpush1.msra.mxu0 %v2286_v3  ;;  %5749 = vmatprep.subr.mxu1 %v2288_v22  ;;  %v3090_v3 = vld [vmem:[#allocation2 + $0x270] sm:$0xff] }
 0x57d   :  { %2594 = vmatprep.subr.mxu0 %v2284_v4  ;;  %5750 = vmatpush3.msra.mxu1 %v2288_v22  ;;  %v3088_v22 = vld [vmem:[#allocation2 + $0x260] sm:$0xff]  ;;  %v3087_v4 = vld [vmem:[#allocation2 + $0x258] sm:$0xff] }
 0x57e   :  { %2595 = vmatpush1.msra.mxu0 %v2283_v23  ;;  %5751 = vmatprep.subr.mxu1 %v2285_v24  ;;  %v3085_v23 = vld [vmem:[#allocation2 + $0x248] sm:$0xff] }
 0x57f   :  { %2596 = vmatprep.subr.mxu0 %v2281_v5  ;;  %5752 = vmatpush3.msra.mxu1 %v2285_v24  ;;  %v4853_v24 = vld [vmem:[%s7081_s7 + $0x30] sm:$0xff]  ;;  %v4854_v5 = vld [vmem:[%s7081_s7 + $0x38] sm:$0xf] }
 0x580   :  { %2597 = vmatpush1.msra.mxu0 %v2280_v26  ;;  %5753 = vmatprep.subr.mxu1 %v2282_v27  ;;  %v3082_v26 = vld [vmem:[#allocation2 + $0x230] sm:$0xff] }
 0x581   :  { %2598 = vmatprep.subr.mxu0 %v2278_v6  ;;  %5754 = vmatpush3.msra.mxu1 %v2282_v27  ;;  %v3081_v27 = vld [vmem:[#allocation2 + $0x228] sm:$0xff]  ;;  %v3095_v6 = vld [vmem:[#allocation2 + $0x298] sm:$0xff] }
 0x582   :  { %2599 = vmatpush1.msra.mxu0 %v2277_v28  ;;  %2632 = vmatprep.mubr.f32.mxu0 %v6011_v32  ;;  %v3079_v28 = vld [vmem:[#allocation2 + $0x218] sm:$0xff] }
 0x583   :  { %5755 = vmatprep.subr.mxu1 %v2279_v30  ;;  %5757 = vmatprep.mubr.msk.f32.mxu1 %vm1979_vm2, %v2268_v29 }
 0x584   :  { %4840 = vmatmul.mubr.msk.f32.vlgmr.msra.gmra.mxu0 %vm1979_vm2, %v2268_v29  ;;  %5756 = vmatpush3.msra.mxu1 %v2279_v30  ;;  %v3078_v29 = vld [vmem:[#allocation2 + $0x210] sm:$0xff]  ;;  %v3092_v30 = vld [vmem:[#allocation2 + $0x280] sm:$0xff] }
 0x585   :  { %5760 = vmatprep.subr.msk.mxu0 %vm2198_vm5, %v6738_v40  ;;  %5758 = vmatmul.mubr.msk.f32.vlgmr.msra.gmra.mxu1 %vm1979_vm2, %v5714_v25 }
 0x586   :  { %5761 = vmatpush3.msk.msra.mxu0 %vm2198_vm5, %v6738_v40  ;;  %2850 = vmatprep.subr.mxu1 %v2824_v31  ;;  %v3076_v31 = vld [vmem:[#allocation2 + $0x200] sm:$0xff] }
 0x587   :  { %5762 = vmatprep.subr.mxu0 %v6740_v42  ;;  %2851 = vmatpush1.msra.mxu1 %v2823_v33  ;;  %v3075_v33 = vld [vmem:[#allocation2 + $0x1f8] sm:$0xff] }
 0x588   :  { %2638 = vmatprep.mubr.f32.mxu0 %v6011_v32  ;;  %5763 = vmatpush3.msra.mxu0 %v6740_v42 }
 0x589   :  { %2852 = vmatprep.subr.mxu1 %v2821_v34  ;;  %4841 = vmatmul.mubr.msk.f32.gmra.mxu0 %vm1979_vm2, %v5714_v25  ;;  %v3084_v25 = vld [vmem:[#allocation2 + $0x240] sm:$0xff]  ;;  %v3089_v34 = vld [vmem:[#allocation2 + $0x268] sm:$0xff] }
 0x58a   :  { %5764 = vmatprep.subr.mxu0 %v6750_v43  ;;  %2853 = vmatpush1.msra.mxu1 %v2820_v35  ;;  %v3086_v35 = vld [vmem:[#allocation2 + $0x250] sm:$0xff] }
 0x58b   :  { %5765 = vmatpush3.msra.mxu0 %v6750_v43  ;;  %2854 = vmatprep.subr.mxu1 %v2818_v36  ;;  %v3083_v36 = vld [vmem:[#allocation2 + $0x238] sm:$0xff] }
 0x58c   :  { %5766 = vmatprep.subr.mxu0 %v6756_v44  ;;  %2855 = vmatpush1.msra.mxu1 %v2817_v37  ;;  %v3080_v37 = vld [vmem:[#allocation2 + $0x220] sm:$0xff] }
 0x58d   :  { %5767 = vmatpush3.msra.mxu0 %v6756_v44  ;;  %5768 = vmatprep.mubr.msk.f32.mxu0 %vm2191_vm4, %v4844_v38  ;;  %v3077_v38 = vld [vmem:[#allocation2 + $0x208] sm:$0xff] }
 0x58e   :  { %2856 = vmatprep.subr.mxu1 %v2815_v39  ;;  %5769 = vmatmul.mubr.msk.f32.vlgmr.msra.gmra.mxu0 %vm2191_vm4, %v4845_v41  ;;  %v3364_v39 = vld [vmem:[#allocation2 + $0x338] sm:$0xff] }
 0x58f   :  { %2857 = vmatpush1.msra.mxu1 %v2814_v45  ;;  %2896 = vmatprep.mubr.f32.mxu1 %v6011_v32 }
 0x590   :  { %2858 = vmatprep.subr.mxu1 %v2812_v46  ;;  %5771 = vmatprep.subr.mxu0 %v2825_v52 }
 0x591   :  { %2859 = vmatpush1.msra.mxu1 %v2811_v47  ;;  %5772 = vmatpush3.msra.mxu0 %v2825_v52 }
 0x592   :  { %2860 = vmatprep.subr.mxu1 %v2809_v48  ;;  %5773 = vmatprep.subr.mxu0 %v2822_v53 }
 0x593   :  { %2861 = vmatpush1.msra.mxu1 %v2808_v49  ;;  %5774 = vmatpush3.msra.mxu0 %v2822_v53 }
 0x594   :  { %2862 = vmatprep.subr.mxu1 %v2806_v50  ;;  %5775 = vmatprep.subr.mxu0 %v2819_v54 }
 0x595   :  { %2863 = vmatpush1.msra.mxu1 %v2805_v51  ;;  %5776 = vmatpush3.msra.mxu0 %v2819_v54 }
 0x596   :  { %5788 = vmatprep.subr.msk.mxu1 %vm2198_vm5, %v6738_v40  ;;  %5777 = vmatprep.subr.mxu0 %v2816_v55 }
 0x597   :  { %5778 = vmatpush3.msra.mxu0 %v2816_v55 }
 0x598   :  { %5779 = vmatprep.subr.mxu0 %v2813_v56 }
 0x599   :  { %5780 = vmatpush3.msra.mxu0 %v2813_v56 }
 0x59a   :  { %5781 = vmatprep.subr.mxu0 %v2810_v57 }
 0x59b   :  { %5782 = vmatpush3.msra.mxu0 %v2810_v57  ;;  %v3363_v57 = vld [vmem:[#allocation2 + $0x330] sm:$0xff] }
 0x59c   :  { %5783 = vmatprep.subr.mxu0 %v2807_v58 }
 0x59d   :  { %5784 = vmatpush3.msra.mxu0 %v2807_v58  ;;  %v3361_v58 = vld [vmem:[#allocation2 + $0x320] sm:$0xff] }
 0x59e   :  { %3120 = vmatprep.subr.mxu0 %v3094_v59  ;;  %v3360_v59 = vld [vmem:[#allocation2 + $0x318] sm:$0xff] }
 0x634   :  { %v2476_v60 = vpop.f32.mrf.mxu0 }
 0x635   :  { %v5742_v63 = vpop.f32.mrf.mxu1 }
 0x636   :  { %v2478_v61 = vpop.f32.mrf.mxu0 }
 0x637   :  { %v6807_v11 = vpop.f32.mrf.mxu1 }
 0x639   :  { %v2482_v62 = vpop.f32.mrf.mxu0 }
 0x63b   :  { %v2484_v10 = vpop.f32.mrf.mxu0 }
 0x644   :  { %v2634_v12 = vpop.f32.mrf.mxu0 }
 0x645   :  { %v6809_v13 = vadd.f32 %v2634_v12, %v2476_v60  ;;  %v5759_v14 = vpop.f32.mrf.mxu1  ;;  %v3358_v60 = vld [vmem:[#allocation2 + $0x308] sm:$0xff] }
 0x646   :  { %v6811_v15 = vadd.f32 %v5759_v14, %v5742_v63  ;;  %v2636_v16 = vpop.f32.mrf.mxu0  ;;  %v4862_v63 = vld [vmem:[%s7081_s7 + $0x40] sm:$0xff]  ;;  %v4863_v12 = vld [vmem:[%s7081_s7 + $0x48] sm:$0xf]  ;;  %v3351_v14 = vld [vmem:[#allocation2 + $0x2d0] sm:$0xff] }
 0x647   :  { %v6813_v17 = vadd.f32 %v2636_v16, %v2478_v61  ;;  %v6843_v41 = vpop.f32.mrf.mxu1  ;;  %v3357_v61 = vld [vmem:[#allocation2 + $0x300] sm:$0xff] }
 0x648   :  { %v3349_v16 = vld [vmem:[#allocation2 + $0x2c0] sm:$0xff] }
 0x649   :  { %v2640_v0 = vpop.f32.mrf.mxu0 }
 0x64a   :  { %v6815_v1 = vadd.f32 %v2640_v0, %v2482_v62  ;;  %v3355_v62 = vld [vmem:[#allocation2 + $0x2f0] sm:$0xff]  ;;  %v3362_v0 = vld [vmem:[#allocation2 + $0x328] sm:$0xff] }
 0x64b   :  { %v2642_v2 = vpop.f32.mrf.mxu0 }
 0x64c   :  { %v6817_v18 = vadd.f32 %v2642_v2, %v2484_v10  ;;  %v3354_v10 = vld [vmem:[#allocation2 + $0x2e8] sm:$0xff]  ;;  %v3345_v2 = vld [vmem:[#allocation2 + $0x2a0] sm:$0xff] }
 0x64e   :  { %v5770_v7 = vpop.f32.mrf.mxu0 }
 0x650   :  { %v2795_v19 = vpop.f32.mrf.mxu0 }
 0x651   :  { %4849 = vmatmul.mubr.msk.f32.vlgmr.msra.gmra.mxu1 %vm1979_vm2, %v2795_v19  ;;  %5785 = vmatprep.mubr.msk.f32.mxu0 %vm1979_vm2, %v2795_v19  ;;  %v3353_v19 = vld [vmem:[#allocation2 + $0x2e0] sm:$0xff] }
 0x652   :  { %5789 = vmatpush3.msk.msra.mxu1 %vm2198_vm5, %v6738_v40  ;;  %5786 = vmatmul.mubr.msk.f32.vlgmr.msra.gmra.mxu0 %vm1979_vm2, %v5770_v7 }
 0x653   :  { %5790 = vmatprep.subr.mxu1 %v6740_v42  ;;  %3121 = vmatpush1.msra.mxu0 %v3093_v20  ;;  %v3350_v20 = vld [vmem:[#allocation2 + $0x2c8] sm:$0xff] }
 0x654   :  { %5791 = vmatpush3.msra.mxu1 %v6740_v42  ;;  %3122 = vmatprep.subr.mxu0 %v3091_v21  ;;  %v3347_v21 = vld [vmem:[#allocation2 + $0x2b0] sm:$0xff] }
 0x655   :  { %2902 = vmatprep.mubr.f32.mxu1 %v6011_v32  ;;  %5792 = vmatprep.subr.mxu1 %v6750_v43 }
 0x656   :  { %3123 = vmatpush1.msra.mxu0 %v3090_v3  ;;  %4850 = vmatmul.mubr.msk.f32.gmra.mxu1 %vm1979_vm2, %v5770_v7  ;;  %v3356_v7 = vld [vmem:[#allocation2 + $0x2f8] sm:$0xff]  ;;  %v3634_v3 = vld [vmem:[#allocation2 + $0x3e0] sm:$0xff] }
 0x657   :  { %5793 = vmatpush3.msra.mxu1 %v6750_v43  ;;  %3124 = vmatprep.subr.mxu0 %v3088_v22 }
 0x658   :  { %5794 = vmatprep.subr.mxu1 %v6756_v44  ;;  %3125 = vmatpush1.msra.mxu0 %v3087_v4 }
 0x659   :  { %5795 = vmatpush3.msra.mxu1 %v6756_v44  ;;  %3126 = vmatprep.subr.mxu0 %v3085_v23 }
 0x65a   :  { %5796 = vmatprep.mubr.msk.f32.mxu1 %vm2191_vm4, %v4853_v24  ;;  %3127 = vmatpush1.msra.mxu0 %v3084_v25 }
 0x65b   :  { %5797 = vmatmul.mubr.msk.f32.vlgmr.msra.gmra.mxu1 %vm2191_vm4, %v4854_v5  ;;  %3128 = vmatprep.subr.mxu0 %v3082_v26 }
 0x65c   :  { %3129 = vmatpush1.msra.mxu0 %v3081_v27  ;;  %5799 = vmatprep.subr.mxu1 %v3095_v6 }
 0x65d   :  { %3130 = vmatprep.subr.mxu0 %v3079_v28  ;;  %5800 = vmatpush3.msra.mxu1 %v3095_v6 }
 0x65e   :  { %3131 = vmatpush1.msra.mxu0 %v3078_v29  ;;  %5801 = vmatprep.subr.mxu1 %v3092_v30 }
 0x65f   :  { %3132 = vmatprep.subr.mxu0 %v3076_v31  ;;  %5802 = vmatpush3.msra.mxu1 %v3092_v30 }
 0x660   :  { %3133 = vmatpush1.msra.mxu0 %v3075_v33  ;;  %3166 = vmatprep.mubr.f32.mxu0 %v6011_v32  ;;  %v3633_v33 = vld [vmem:[#allocation2 + $0x3d8] sm:$0xff] }
 0x661   :  { %5816 = vmatprep.subr.msk.mxu0 %vm2198_vm5, %v6738_v40  ;;  %5803 = vmatprep.subr.mxu1 %v3089_v34 }
 0x662   :  { %5804 = vmatpush3.msra.mxu1 %v3089_v34  ;;  %v3631_v34 = vld [vmem:[#allocation2 + $0x3c8] sm:$0xff] }
 0x663   :  { %5805 = vmatprep.subr.mxu1 %v3086_v35 }
 0x664   :  { %5806 = vmatpush3.msra.mxu1 %v3086_v35  ;;  %v3630_v35 = vld [vmem:[#allocation2 + $0x3c0] sm:$0xff] }
 0x665   :  { %5807 = vmatprep.subr.mxu1 %v3083_v36 }
 0x666   :  { %5808 = vmatpush3.msra.mxu1 %v3083_v36  ;;  %v3628_v36 = vld [vmem:[#allocation2 + $0x3b0] sm:$0xff] }
 0x667   :  { %5809 = vmatprep.subr.mxu1 %v3080_v37 }
 0x668   :  { %5810 = vmatpush3.msra.mxu1 %v3080_v37  ;;  %v3627_v37 = vld [vmem:[#allocation2 + $0x3a8] sm:$0xff] }
 0x669   :  { %5811 = vmatprep.subr.mxu1 %v3077_v38 }
 0x66a   :  { %5812 = vmatpush3.msra.mxu1 %v3077_v38  ;;  %v3625_v38 = vld [vmem:[#allocation2 + $0x398] sm:$0xff] }
 0x66b   :  { %3390 = vmatprep.subr.mxu1 %v3364_v39  ;;  %v4871_v39 = vld [vmem:[%s7081_s7 + $0x50] sm:$0xff] }
 0x711   :  { %v2898_v45 = vpop.f32.mrf.mxu1 }
 0x712   :  { %v6846_v46 = vadd.f32 %v2898_v45, %v6809_v13  ;;  %v5787_v47 = vpop.f32.mrf.mxu0  ;;  %v3352_v13 = vld [vmem:[#allocation2 + $0x2d8] sm:$0xff]  ;;  %v3624_v45 = vld [vmem:[#allocation2 + $0x390] sm:$0xff] }
 0x713   :  { %v6849_v48 = vadd.f32 %v5787_v47, %v6811_v15  ;;  %v2900_v49 = vpop.f32.mrf.mxu1  ;;  %v3365_v15 = vld [vmem:[#allocation2 + $0x340] sm:$0xff] }
 0x714   :  { %v6852_v50 = vadd.f32 %v2900_v49, %v6813_v17  ;;  %v3348_v17 = vld [vmem:[#allocation2 + $0x2b8] sm:$0xff]  ;;  %v6884_v22 = vpop.f32.mrf.mxu0  ;;  %v3622_v47 = vld [vmem:[#allocation2 + $0x380] sm:$0xff]  ;;  %v3635_v49 = vld [vmem:[#allocation2 + $0x3e8] sm:$0xff] }
 0x716   :  { %v2904_v51 = vpop.f32.mrf.mxu1 }
 0x717   :  { %v6855_v52 = vadd.f32 %v2904_v51, %v6815_v1  ;;  %v3346_v1 = vld [vmem:[#allocation2 + $0x2a8] sm:$0xff]  ;;  %v3618_v51 = vld [vmem:[#allocation2 + $0x360] sm:$0xff] }
 0x718   :  { %v2906_v53 = vpop.f32.mrf.mxu1 }
 0x719   :  { %v6858_v54 = vadd.f32 %v2906_v53, %v6817_v18  ;;  %v3359_v18 = vld [vmem:[#allocation2 + $0x310] sm:$0xff] }
 0x71a   :  { %v3616_v53 = vld [vmem:[#allocation2 + $0x350] sm:$0xff] }
 0x71b   :  { %v5798_v55 = vpop.f32.mrf.mxu1 }
 0x71d   :  { %v3065_v56 = vpop.f32.mrf.mxu1 }
 0x71e   :  { %4858 = vmatmul.mubr.msk.f32.vlgmr.msra.gmra.mxu0 %vm1979_vm2, %v3065_v56  ;;  %5813 = vmatprep.mubr.msk.f32.mxu1 %vm1979_vm2, %v3065_v56  ;;  %v3626_v56 = vld [vmem:[#allocation2 + $0x3a0] sm:$0xff] }
 0x71f   :  { %5817 = vmatpush3.msk.msra.mxu0 %vm2198_vm5, %v6738_v40  ;;  %5814 = vmatmul.mubr.msk.f32.vlgmr.msra.gmra.mxu1 %vm1979_vm2, %v5798_v55 }
 0x720   :  { %5818 = vmatprep.subr.mxu0 %v6740_v42  ;;  %3391 = vmatpush1.msra.mxu1 %v3363_v57  ;;  %v3623_v57 = vld [vmem:[#allocation2 + $0x388] sm:$0xff] }
 0x721   :  { %5819 = vmatpush3.msra.mxu0 %v6740_v42  ;;  %3392 = vmatprep.subr.mxu1 %v3361_v58  ;;  %v3620_v58 = vld [vmem:[#allocation2 + $0x370] sm:$0xff] }
 0x722   :  { %3172 = vmatprep.mubr.f32.mxu0 %v6011_v32  ;;  %5820 = vmatprep.subr.mxu0 %v6750_v43 }
 0x723   :  { %3393 = vmatpush1.msra.mxu1 %v3360_v59  ;;  %4859 = vmatmul.mubr.msk.f32.gmra.mxu0 %vm1979_vm2, %v5798_v55  ;;  %v3629_v55 = vld [vmem:[#allocation2 + $0x3b8] sm:$0xff] }
 0x724   :  { %5821 = vmatpush3.msra.mxu0 %v6750_v43  ;;  %3394 = vmatprep.subr.mxu1 %v3358_v60  ;;  %v3617_v59 = vld [vmem:[#allocation2 + $0x358] sm:$0xff]  ;;  %v3904_v60 = vld [vmem:[#allocation2 + $0x488] sm:$0xff] }
 0x725   :  { %5822 = vmatprep.subr.mxu0 %v6756_v44  ;;  %3395 = vmatpush1.msra.mxu1 %v3357_v61 }
 0x726   :  { %5823 = vmatpush3.msra.mxu0 %v6756_v44  ;;  %3396 = vmatprep.subr.mxu1 %v3355_v62 }
 0x727   :  { %5824 = vmatprep.mubr.msk.f32.mxu0 %vm2191_vm4, %v4862_v63  ;;  %3397 = vmatpush1.msra.mxu1 %v3354_v10 }
 0x728   :  { %5825 = vmatmul.mubr.msk.f32.vlgmr.msra.gmra.mxu0 %vm2191_vm4, %v4863_v12  ;;  %3398 = vmatprep.subr.mxu1 %v3352_v13 }
 0x729   :  { %3399 = vmatpush1.msra.mxu1 %v3351_v14  ;;  %5827 = vmatprep.subr.mxu0 %v3365_v15 }
 0x72a   :  { %3400 = vmatprep.subr.mxu1 %v3349_v16  ;;  %5828 = vmatpush3.msra.mxu0 %v3365_v15 }
 0x72b   :  { %3401 = vmatpush1.msra.mxu1 %v3348_v17  ;;  %5829 = vmatprep.subr.mxu0 %v3362_v0 }
 0x72c   :  { %3402 = vmatprep.subr.mxu1 %v3346_v1  ;;  %5830 = vmatpush3.msra.mxu0 %v3362_v0 }
 0x72d   :  { %3403 = vmatpush1.msra.mxu1 %v3345_v2  ;;  %3436 = vmatprep.mubr.f32.mxu1 %v6011_v32 }
 0x72e   :  { %5844 = vmatprep.subr.msk.mxu1 %vm2198_vm5, %v6738_v40  ;;  %5831 = vmatprep.subr.mxu0 %v3359_v18 }
 0x72f   :  { %5832 = vmatpush3.msra.mxu0 %v3359_v18  ;;  %v3903_v18 = vld [vmem:[#allocation2 + $0x480] sm:$0xff] }
 0x730   :  { %5833 = vmatprep.subr.mxu0 %v3356_v7 }
 0x731   :  { %5834 = vmatpush3.msra.mxu0 %v3356_v7  ;;  %v3901_v7 = vld [vmem:[#allocation2 + $0x470] sm:$0xff] }
 0x732   :  { %5835 = vmatprep.subr.mxu0 %v3353_v19 }
 0x733   :  { %5836 = vmatpush3.msra.mxu0 %v3353_v19  ;;  %v3900_v19 = vld [vmem:[#allocation2 + $0x468] sm:$0xff] }
 0x734   :  { %5837 = vmatprep.subr.mxu0 %v3350_v20 }
 0x735   :  { %5838 = vmatpush3.msra.mxu0 %v3350_v20  ;;  %v3898_v20 = vld [vmem:[#allocation2 + $0x458] sm:$0xff] }
 0x736   :  { %5839 = vmatprep.subr.mxu0 %v3347_v21 }
 0x737   :  { %5840 = vmatpush3.msra.mxu0 %v3347_v21  ;;  %v3897_v21 = vld [vmem:[#allocation2 + $0x450] sm:$0xff] }
 0x738   :  { %3660 = vmatprep.subr.mxu0 %v3634_v3  ;;  %v3895_v3 = vld [vmem:[#allocation2 + $0x440] sm:$0xff] }
 0x7de   :  { %v3168_v4 = vpop.f32.mrf.mxu0 }
 0x7df   :  { %v6887_v23 = vadd.f32 %v3168_v4, %v6846_v46  ;;  %v5815_v24 = vpop.f32.mrf.mxu1  ;;  %v4872_v46 = vld [vmem:[%s7081_s7 + $0x58] sm:$0xf]  ;;  %v4880_v4 = vld [vmem:[%s7081_s7 + $0x60] sm:$0xff] }
 0x7e0   :  { %v6890_v25 = vadd.f32 %v5815_v24, %v6849_v48  ;;  %v3170_v5 = vpop.f32.mrf.mxu0  ;;  %v3621_v48 = vld [vmem:[#allocation2 + $0x378] sm:$0xff]  ;;  %v4881_v24 = vld [vmem:[%s7081_s7 + $0x68] sm:$0xf] }
 0x7e1   :  { %v6893_v26 = vadd.f32 %v3170_v5, %v6852_v50  ;;  %v3619_v50 = vld [vmem:[#allocation2 + $0x368] sm:$0xff]  ;;  %v6925_v61 = vpop.f32.mrf.mxu1  ;;  %v3891_v5 = vld [vmem:[#allocation2 + $0x420] sm:$0xff] }
 0x7e3   :  { %v3174_v27 = vpop.f32.mrf.mxu0 }
 0x7e4   :  { %v6896_v6 = vadd.f32 %v3174_v27, %v6855_v52  ;;  %v3632_v52 = vld [vmem:[#allocation2 + $0x3d0] sm:$0xff] }
 0x7e5   :  { %v3176_v28 = vpop.f32.mrf.mxu0  ;;  %v3889_v27 = vld [vmem:[#allocation2 + $0x410] sm:$0xff] }
 0x7e6   :  { %v6899_v29 = vadd.f32 %v3176_v28, %v6858_v54  ;;  %v3615_v54 = vld [vmem:[#allocation2 + $0x348] sm:$0xff]  ;;  %v3902_v28 = vld [vmem:[#allocation2 + $0x478] sm:$0xff] }
 0x7e8   :  { %v5826_v30 = vpop.f32.mrf.mxu0 }
 0x7ea   :  { %v3335_v31 = vpop.f32.mrf.mxu0 }
 0x7eb   :  { %4867 = vmatmul.mubr.msk.f32.vlgmr.msra.gmra.mxu1 %vm1979_vm2, %v3335_v31  ;;  %5841 = vmatprep.mubr.msk.f32.mxu0 %vm1979_vm2, %v3335_v31  ;;  %v3899_v31 = vld [vmem:[#allocation2 + $0x460] sm:$0xff] }
 0x7ec   :  { %5845 = vmatpush3.msk.msra.mxu1 %vm2198_vm5, %v6738_v40  ;;  %5842 = vmatmul.mubr.msk.f32.vlgmr.msra.gmra.mxu0 %vm1979_vm2, %v5826_v30 }
 0x7ed   :  { %5846 = vmatprep.subr.mxu1 %v6740_v42  ;;  %3661 = vmatpush1.msra.mxu0 %v3633_v33  ;;  %v3896_v33 = vld [vmem:[#allocation2 + $0x448] sm:$0xff] }
 0x7ee   :  { %5847 = vmatpush3.msra.mxu1 %v6740_v42  ;;  %3662 = vmatprep.subr.mxu0 %v3631_v34  ;;  %v3893_v34 = vld [vmem:[#allocation2 + $0x430] sm:$0xff] }
 0x7ef   :  { %3442 = vmatprep.mubr.f32.mxu1 %v6011_v32  ;;  %5848 = vmatprep.subr.mxu1 %v6750_v43 }
 0x7f0   :  { %3663 = vmatpush1.msra.mxu0 %v3630_v35  ;;  %4868 = vmatmul.mubr.msk.f32.gmra.mxu1 %vm1979_vm2, %v5826_v30  ;;  %v3885_v30 = vld [vmem:[#allocation2 + $0x3f0] sm:$0xff]  ;;  %v3890_v35 = vld [vmem:[#allocation2 + $0x418] sm:$0xff] }
 0x7f1   :  { %5849 = vmatpush3.msra.mxu1 %v6750_v43  ;;  %3664 = vmatprep.subr.mxu0 %v3628_v36  ;;  %v3887_v36 = vld [vmem:[#allocation2 + $0x400] sm:$0xff] }
 0x7f2   :  { %5850 = vmatprep.subr.mxu1 %v6756_v44  ;;  %3665 = vmatpush1.msra.mxu0 %v3627_v37  ;;  %v4174_v37 = vld [vmem:[#allocation2 + $0x530] sm:$0xff] }
 0x7f3   :  { %5851 = vmatpush3.msra.mxu1 %v6756_v44  ;;  %3666 = vmatprep.subr.mxu0 %v3625_v38 }
 0x7f4   :  { %5852 = vmatprep.mubr.msk.f32.mxu1 %vm2191_vm4, %v4871_v39  ;;  %3667 = vmatpush1.msra.mxu0 %v3624_v45 }
 0x7f5   :  { %5853 = vmatmul.mubr.msk.f32.vlgmr.msra.gmra.mxu1 %vm2191_vm4, %v4872_v46  ;;  %3668 = vmatprep.subr.mxu0 %v3622_v47 }
 0x7f6   :  { %3669 = vmatpush1.msra.mxu0 %v3621_v48  ;;  %5855 = vmatprep.subr.mxu1 %v3635_v49 }
 0x7f7   :  { %3670 = vmatprep.subr.mxu0 %v3619_v50  ;;  %5856 = vmatpush3.msra.mxu1 %v3635_v49 }
 0x7f8   :  { %3671 = vmatpush1.msra.mxu0 %v3618_v51  ;;  %5857 = vmatprep.subr.mxu1 %v3632_v52 }
 0x7f9   :  { %3672 = vmatprep.subr.mxu0 %v3616_v53  ;;  %5858 = vmatpush3.msra.mxu1 %v3632_v52 }
 0x7fa   :  { %3673 = vmatpush1.msra.mxu0 %v3615_v54  ;;  %3706 = vmatprep.mubr.f32.mxu0 %v6011_v32 }
 0x7fb   :  { %5872 = vmatprep.subr.msk.mxu0 %vm2198_vm5, %v6738_v40  ;;  %5859 = vmatprep.subr.mxu1 %v3629_v55 }
 0x7fc   :  { %5860 = vmatpush3.msra.mxu1 %v3629_v55 }
 0x7fd   :  { %5861 = vmatprep.subr.mxu1 %v3626_v56 }
 0x7fe   :  { %5862 = vmatpush3.msra.mxu1 %v3626_v56  ;;  %v4173_v56 = vld [vmem:[#allocation2 + $0x528] sm:$0xff] }
 0x7ff   :  { %5863 = vmatprep.subr.mxu1 %v3623_v57 }
 0x800   :  { %5864 = vmatpush3.msra.mxu1 %v3623_v57  ;;  %v4171_v57 = vld [vmem:[#allocation2 + $0x518] sm:$0xff] }
 0x801   :  { %5865 = vmatprep.subr.mxu1 %v3620_v58 }
 0x802   :  { %5866 = vmatpush3.msra.mxu1 %v3620_v58  ;;  %v4170_v58 = vld [vmem:[#allocation2 + $0x510] sm:$0xff] }
 0x803   :  { %5867 = vmatprep.subr.mxu1 %v3617_v59 }
 0x804   :  { %5868 = vmatpush3.msra.mxu1 %v3617_v59  ;;  %v4168_v59 = vld [vmem:[#allocation2 + $0x500] sm:$0xff] }
 0x805   :  { %3930 = vmatprep.subr.mxu1 %v3904_v60  ;;  %v4167_v60 = vld [vmem:[#allocation2 + $0x4f8] sm:$0xff] }
 0x8ab   :  { %v3438_v62 = vpop.f32.mrf.mxu1 }
 0x8ac   :  { %v6928_v63 = vadd.f32 %v3438_v62, %v6887_v23  ;;  %v5843_v10 = vpop.f32.mrf.mxu0  ;;  %v3894_v23 = vld [vmem:[#allocation2 + $0x438] sm:$0xff]  ;;  %v4165_v62 = vld [vmem:[#allocation2 + $0x4e8] sm:$0xff] }
 0x8ad   :  { %v6931_v12 = vadd.f32 %v5843_v10, %v6890_v25  ;;  %v3440_v13 = vpop.f32.mrf.mxu1  ;;  %v3892_v25 = vld [vmem:[#allocation2 + $0x428] sm:$0xff]  ;;  %v4164_v10 = vld [vmem:[#allocation2 + $0x4e0] sm:$0xff] }
 0x8ae   :  { %v6934_v14 = vadd.f32 %v3440_v13, %v6893_v26  ;;  %v3905_v26 = vld [vmem:[#allocation2 + $0x490] sm:$0xff]  ;;  %v6966_v38 = vpop.f32.mrf.mxu0 }
 0x8af   :  { %v4162_v13 = vld [vmem:[#allocation2 + $0x4d0] sm:$0xff] }
 0x8b0   :  { %v3444_v15 = vpop.f32.mrf.mxu1 }
 0x8b1   :  { %v6937_v16 = vadd.f32 %v3444_v15, %v6896_v6  ;;  %v3888_v6 = vld [vmem:[#allocation2 + $0x408] sm:$0xff]  ;;  %v4175_v15 = vld [vmem:[#allocation2 + $0x538] sm:$0xff] }
 0x8b2   :  { %v3446_v17 = vpop.f32.mrf.mxu1 }
 0x8b3   :  { %v6940_v0 = vadd.f32 %v3446_v17, %v6899_v29  ;;  %v3886_v29 = vld [vmem:[#allocation2 + $0x3f8] sm:$0xff]  ;;  %v4158_v17 = vld [vmem:[#allocation2 + $0x4b0] sm:$0xff] }
 0x8b5   :  { %v5854_v1 = vpop.f32.mrf.mxu1 }
 0x8b7   :  { %v3605_v2 = vpop.f32.mrf.mxu1 }
 0x8b8   :  { %4876 = vmatmul.mubr.msk.f32.vlgmr.msra.gmra.mxu0 %vm1979_vm2, %v3605_v2  ;;  %5869 = vmatprep.mubr.msk.f32.mxu1 %vm1979_vm2, %v3605_v2  ;;  %v4172_v2 = vld [vmem:[#allocation2 + $0x520] sm:$0xff] }
 0x8b9   :  { %5873 = vmatpush3.msk.msra.mxu0 %vm2198_vm5, %v6738_v40  ;;  %5870 = vmatmul.mubr.msk.f32.vlgmr.msra.gmra.mxu1 %vm1979_vm2, %v5854_v1 }
 0x8ba   :  { %5874 = vmatprep.subr.mxu0 %v6740_v42  ;;  %3931 = vmatpush1.msra.mxu1 %v3903_v18  ;;  %v4169_v18 = vld [vmem:[#allocation2 + $0x508] sm:$0xff] }
 0x8bb   :  { %5875 = vmatpush3.msra.mxu0 %v6740_v42  ;;  %3932 = vmatprep.subr.mxu1 %v3901_v7  ;;  %v4166_v7 = vld [vmem:[#allocation2 + $0x4f0] sm:$0xff] }
 0x8bc   :  { %3712 = vmatprep.mubr.f32.mxu0 %v6011_v32  ;;  %5876 = vmatprep.subr.mxu0 %v6750_v43 }
 0x8bd   :  { %3933 = vmatpush1.msra.mxu1 %v3900_v19  ;;  %4877 = vmatmul.mubr.msk.f32.gmra.mxu0 %vm1979_vm2, %v5854_v1  ;;  %v4155_v1 = vld [vmem:[#allocation2 + $0x498] sm:$0xff] }
 0x8be   :  { %5877 = vmatpush3.msra.mxu0 %v6750_v43  ;;  %3934 = vmatprep.subr.mxu1 %v3898_v20  ;;  %v4163_v19 = vld [vmem:[#allocation2 + $0x4d8] sm:$0xff]  ;;  %v4160_v20 = vld [vmem:[#allocation2 + $0x4c0] sm:$0xff] }
 0x8bf   :  { %5878 = vmatprep.subr.mxu0 %v6756_v44  ;;  %3935 = vmatpush1.msra.mxu1 %v3897_v21  ;;  %v4157_v21 = vld [vmem:[#allocation2 + $0x4a8] sm:$0xff] }
 0x8c0   :  { %5879 = vmatpush3.msra.mxu0 %v6756_v44  ;;  %3936 = vmatprep.subr.mxu1 %v3895_v3  ;;  %v4444_v3 = vld [vmem:[#allocation2 + $0x5d8] sm:$0xff] }
 0x8c1   :  { %5880 = vmatprep.mubr.msk.f32.mxu0 %vm2191_vm4, %v4880_v4  ;;  %3937 = vmatpush1.msra.mxu1 %v3894_v23 }
 0x8c2   :  { %5881 = vmatmul.mubr.msk.f32.vlgmr.msra.gmra.mxu0 %vm2191_vm4, %v4881_v24  ;;  %3938 = vmatprep.subr.mxu1 %v3892_v25 }
 0x8c3   :  { %3939 = vmatpush1.msra.mxu1 %v3891_v5  ;;  %5883 = vmatprep.subr.mxu0 %v3905_v26 }
 0x8c4   :  { %3940 = vmatprep.subr.mxu1 %v3889_v27  ;;  %5884 = vmatpush3.msra.mxu0 %v3905_v26 }
 0x8c5   :  { %3941 = vmatpush1.msra.mxu1 %v3888_v6  ;;  %5885 = vmatprep.subr.mxu0 %v3902_v28 }
 0x8c6   :  { %3942 = vmatprep.subr.mxu1 %v3886_v29  ;;  %5886 = vmatpush3.msra.mxu0 %v3902_v28 }
 0x8c7   :  { %3943 = vmatpush1.msra.mxu1 %v3885_v30  ;;  %3976 = vmatprep.mubr.f32.mxu1 %v6011_v32 }
 0x8c8   :  { %5900 = vmatprep.subr.msk.mxu1 %vm2198_vm5, %v6738_v40  ;;  %5887 = vmatprep.subr.mxu0 %v3899_v31 }
 0x8c9   :  { %5888 = vmatpush3.msra.mxu0 %v3899_v31 }
 0x8ca   :  { %5889 = vmatprep.subr.mxu0 %v3896_v33 }
 0x8cb   :  { %5890 = vmatpush3.msra.mxu0 %v3896_v33 }
 0x8cc   :  { %5891 = vmatprep.subr.mxu0 %v3893_v34 }
 0x8cd   :  { %5892 = vmatpush3.msra.mxu0 %v3893_v34  ;;  %v4443_v34 = vld [vmem:[#allocation2 + $0x5d0] sm:$0xff] }
 0x8ce   :  { %5893 = vmatprep.subr.mxu0 %v3890_v35 }
 0x8cf   :  { %5894 = vmatpush3.msra.mxu0 %v3890_v35  ;;  %v4898_v35 = vld [vmem:[%s7081_s7 + $0x80] sm:$0xff] }
 0x8d0   :  { %5895 = vmatprep.subr.mxu0 %v3887_v36 }
 0x8d1   :  { %5896 = vmatpush3.msra.mxu0 %v3887_v36  ;;  %v4441_v36 = vld [vmem:[#allocation2 + $0x5c0] sm:$0xff] }
 0x8d2   :  { %4200 = vmatprep.subr.mxu0 %v4174_v37  ;;  %v4445_v37 = vld [vmem:[#allocation2 + $0x5e0] sm:$0xff] }
 0x978   :  { %v3708_v39 = vpop.f32.mrf.mxu0 }
 0x979   :  { %v6969_v45 = vadd.f32 %v3708_v39, %v6928_v63  ;;  %v5871_v46 = vpop.f32.mrf.mxu1  ;;  %v4889_v63 = vld [vmem:[%s7081_s7 + $0x70] sm:$0xff]  ;;  %v4438_v39 = vld [vmem:[#allocation2 + $0x5a8] sm:$0xff] }
 0x97a   :  { %v6972_v47 = vadd.f32 %v5871_v46, %v6931_v12  ;;  %v3710_v48 = vpop.f32.mrf.mxu0  ;;  %v4890_v12 = vld [vmem:[%s7081_s7 + $0x78] sm:$0xf]  ;;  %v4439_v46 = vld [vmem:[#allocation2 + $0x5b0] sm:$0xff] }
 0x97b   :  { %v6975_v49 = vadd.f32 %v3710_v48, %v6934_v14  ;;  %v4161_v14 = vld [vmem:[#allocation2 + $0x4c8] sm:$0xff]  ;;  %v7007_v4 = vpop.f32.mrf.mxu1  ;;  %v4436_v48 = vld [vmem:[#allocation2 + $0x598] sm:$0xff] }
 0x97d   :  { %v3714_v50 = vpop.f32.mrf.mxu0 }
 0x97e   :  { %v6978_v51 = vadd.f32 %v3714_v50, %v6937_v16  ;;  %v4159_v16 = vld [vmem:[#allocation2 + $0x4b8] sm:$0xff]  ;;  %v4431_v50 = vld [vmem:[#allocation2 + $0x570] sm:$0xff] }
 0x97f   :  { %v3716_v52 = vpop.f32.mrf.mxu0 }
 0x980   :  { %v6981_v53 = vadd.f32 %v3716_v52, %v6940_v0  ;;  %v4156_v0 = vld [vmem:[#allocation2 + $0x4a0] sm:$0xff] }
 0x981   :  { %v4429_v52 = vld [vmem:[#allocation2 + $0x560] sm:$0xff] }
 0x982   :  { %v5882_v54 = vpop.f32.mrf.mxu0 }
 0x984   :  { %v3875_v55 = vpop.f32.mrf.mxu0 }
 0x985   :  { %4885 = vmatmul.mubr.msk.f32.vlgmr.msra.gmra.mxu1 %vm1979_vm2, %v3875_v55  ;;  %5897 = vmatprep.mubr.msk.f32.mxu0 %vm1979_vm2, %v3875_v55  ;;  %v4426_v55 = vld [vmem:[#allocation2 + $0x548] sm:$0xff] }
 0x986   :  { %5901 = vmatpush3.msk.msra.mxu1 %vm2198_vm5, %v6738_v40  ;;  %5898 = vmatmul.mubr.msk.f32.vlgmr.msra.gmra.mxu0 %vm1979_vm2, %v5882_v54 }
 0x987   :  { %5902 = vmatprep.subr.mxu1 %v6740_v42  ;;  %4201 = vmatpush1.msra.mxu0 %v4173_v56  ;;  %v4425_v56 = vld [vmem:[#allocation2 + $0x540] sm:$0xff] }
 0x988   :  { %5903 = vmatpush3.msra.mxu1 %v6740_v42  ;;  %4202 = vmatprep.subr.mxu0 %v4171_v57  ;;  %v4427_v57 = vld [vmem:[#allocation2 + $0x550] sm:$0xff] }
 0x989   :  { %3982 = vmatprep.mubr.f32.mxu1 %v6011_v32  ;;  %5904 = vmatprep.subr.mxu1 %v6750_v43 }
 0x98a   :  { %4203 = vmatpush1.msra.mxu0 %v4170_v58  ;;  %4886 = vmatmul.mubr.msk.f32.gmra.mxu1 %vm1979_vm2, %v5882_v54  ;;  %v4430_v54 = vld [vmem:[#allocation2 + $0x568] sm:$0xff] }
 0x98b   :  { %5905 = vmatpush3.msra.mxu1 %v6750_v43  ;;  %4204 = vmatprep.subr.mxu0 %v4168_v59 }
 0x98c   :  { %5906 = vmatprep.subr.mxu1 %v6756_v44  ;;  %4205 = vmatpush1.msra.mxu0 %v4167_v60 }
 0x98d   :  { %5907 = vmatpush3.msra.mxu1 %v6756_v44  ;;  %4206 = vmatprep.subr.mxu0 %v4165_v62 }
 0x98e   :  { %5908 = vmatprep.mubr.msk.f32.mxu1 %vm2191_vm4, %v4889_v63  ;;  %4207 = vmatpush1.msra.mxu0 %v4164_v10 }
 0x98f   :  { %5909 = vmatmul.mubr.msk.f32.vlgmr.msra.gmra.mxu1 %vm2191_vm4, %v4890_v12  ;;  %4208 = vmatprep.subr.mxu0 %v4162_v13 }
 0x990   :  { %4209 = vmatpush1.msra.mxu0 %v4161_v14  ;;  %5911 = vmatprep.subr.mxu1 %v4175_v15 }
 0x991   :  { %4210 = vmatprep.subr.mxu0 %v4159_v16  ;;  %5912 = vmatpush3.msra.mxu1 %v4175_v15 }
 0x992   :  { %4211 = vmatpush1.msra.mxu0 %v4158_v17  ;;  %4246 = vmatprep.mubr.f32.mxu0 %v6011_v32  ;;  %v2712_v17 = vadd.f32 %v6843_v41, %v6807_v11 }
 0x993   :  { %4212 = vmatprep.subr.mxu0 %v4156_v0  ;;  %5913 = vmatprep.subr.mxu1 %v4172_v2 }
 0x994   :  { %4213 = vmatpush1.msra.mxu0 %v4155_v1  ;;  %5914 = vmatpush3.msra.mxu1 %v4172_v2  ;;  %v2986_v0 = vadd.f32 %v6884_v22, %v2712_v17 }
 0x995   :  { %5928 = vmatprep.subr.msk.mxu0 %vm2198_vm5, %v6738_v40  ;;  %5915 = vmatprep.subr.mxu1 %v4169_v18 }
 0x996   :  { %5916 = vmatpush3.msra.mxu1 %v4169_v18  ;;  %v3256_v1 = vadd.f32 %v6925_v61, %v2986_v0 }
 0x997   :  { %5917 = vmatprep.subr.mxu1 %v4166_v7 }
 0x998   :  { %5918 = vmatpush3.msra.mxu1 %v4166_v7  ;;  %v3526_v18 = vadd.f32 %v6966_v38, %v3256_v1  ;;  %v4610_v7 = vld [vmem:[%s7083_s9] sm:$0x7]  ;;  %s6013_s9 = smov [#allocation5]  }
 0x999   :  { %5919 = vmatprep.subr.mxu1 %v4163_v19  ;;  %v4615_v11 = vrot.slane %v4610_v7, %v6715_v9  ;;  %s4644_s30 = sshll.u32 %s6013_s9, 4  ;;  %s4645_s30 = int_to_ptr.vmem [resolvable:$true] %s4644_s30 }
 0x99a   :  { %5920 = vmatpush3.msra.mxu1 %v4163_v19  ;;  %v4622_v19 = vsub.s32 2, %v6712_v8  ;;  %s5984_s11 = scalar_lea.vmem %s4645_s30, 768  ;;  %p5989_p6 = scmp.lt.s32.totalorder %s4645_s30, %s4645_s30 }
 0x99b   :  { %5921 = vmatprep.subr.mxu1 %v4160_v20  ;;  %p5985_p5 = scmp.ne.s32.totalorder %s4645_s30, %s5984_s11  ;;  %p5990_p7 = scmp.lt.s32.totalorder %s5984_s11, %s5984_s11 }
 0x99c   :  { %5922 = vmatpush3.msra.mxu1 %v4160_v20  ;;  %v3796_v20 = vadd.f32 %v7007_v4, %v3526_v18 }
 0x99d   :  { %5923 = vmatprep.subr.mxu1 %v4157_v21  ;;  %p5991_p8 = por %p5990_p7, %p5989_p6 }
 0x99e   :  { %5924 = vmatpush3.msra.mxu1 %v4157_v21 }
 0x99f   :  { %4470 = vmatprep.subr.mxu1 %v4444_v3  ;;  %v4623_v3 = vrot.slane %v4610_v7, %v4622_v19  ;;  %p5992_p9 = pnand %p5991_p8, %p5985_p5 }
 0xa45   :  { %v3978_v23 = vpop.f32.mrf.mxu1 }
 0xa46   :  { %v7010_v24 = vadd.f32 %v3978_v23, %v6969_v45  ;;  %v5899_v25 = vpop.f32.mrf.mxu0  ;;  %v4437_v45 = vld [vmem:[#allocation2 + $0x5a0] sm:$0xff] }
 0xa47   :  { %v7013_v5 = vadd.f32 %v5899_v25, %v6972_v47  ;;  %v3980_v26 = vpop.f32.mrf.mxu1  ;;  %v4435_v47 = vld [vmem:[#allocation2 + $0x590] sm:$0xff] }
 0xa48   :  { %v7016_v27 = vadd.f32 %v3980_v26, %v6975_v49  ;;  %v4432_v49 = vld [vmem:[#allocation2 + $0x578] sm:$0xff]  ;;  %v4055_v58 = vpop.f32.mrf.mxu0 }
 0xa49   :  { %v4066_v41 = vadd.f32 %v4055_v58, %v3796_v20 }
 0xa4a   :  { %v3984_v6 = vpop.f32.mrf.mxu1 }
 0xa4b   :  { %v7019_v28 = vadd.f32 %v3984_v6, %v6978_v51  ;;  %v4433_v51 = vld [vmem:[#allocation2 + $0x580] sm:$0xff] }
 0xa4c   :  { %v3986_v29 = vpop.f32.mrf.mxu1 }
 0xa4d   :  { %v7022_v30 = vadd.f32 %v3986_v29, %v6981_v53  ;;  %v4428_v53 = vld [vmem:[#allocation2 + $0x558] sm:$0xff] }
 0xa4f   :  { %v5910_v31 = vpop.f32.mrf.mxu1 }
 0xa51   :  { %v4145_v33 = vpop.f32.mrf.mxu1 }
 0xa52   :  { %4894 = vmatmul.mubr.msk.f32.vlgmr.msra.gmra.mxu0 %vm1979_vm2, %v4145_v33  ;;  %5925 = vmatprep.mubr.msk.f32.mxu1 %vm1979_vm2, %v4145_v33 }
 0xa53   :  { %5929 = vmatpush3.msk.msra.mxu0 %vm2198_vm5, %v6738_v40  ;;  %5926 = vmatmul.mubr.msk.f32.vlgmr.msra.gmra.mxu1 %vm1979_vm2, %v5910_v31  ;;  %v4899_v40 = vld [vmem:[%s7081_s7 + $0x88] sm:$0xf] }
 0xa54   :  { %5930 = vmatprep.subr.mxu0 %v6740_v42  ;;  %4252 = vmatprep.mubr.f32.mxu0 %v6011_v32 }
 0xa55   :  { %5931 = vmatpush3.msra.mxu0 %v6740_v42  ;;  %4471 = vmatpush1.msra.mxu1 %v4443_v34  ;;  %v4440_v42 = vld [vmem:[#allocation2 + $0x5b8] sm:$0xff] }
 0xa56   :  { %5932 = vmatprep.subr.mxu0 %v6750_v43  ;;  %4895 = vmatmul.mubr.msk.f32.gmra.mxu0 %vm1979_vm2, %v5910_v31 }
 0xa57   :  { %5933 = vmatpush3.msra.mxu0 %v6750_v43  ;;  %5936 = vmatprep.mubr.msk.f32.mxu0 %vm2191_vm4, %v4898_v35  ;;  %v4442_v43 = vld [vmem:[#allocation2 + $0x5c8] sm:$0xff] }
 0xa58   :  { %5934 = vmatprep.subr.mxu0 %v6756_v44  ;;  %4472 = vmatprep.subr.mxu1 %v4441_v36 }
 0xa59   :  { %5935 = vmatpush3.msra.mxu0 %v6756_v44  ;;  %4516 = vmatprep.mubr.f32.mxu1 %v6011_v32  ;;  %v4434_v44 = vld [vmem:[#allocation2 + $0x588] sm:$0xff] }
 0xa5a   :  { %5937 = vmatmul.mubr.msk.f32.vlgmr.msra.gmra.mxu0 %vm2191_vm4, %v4899_v40  ;;  %5939 = vmatprep.subr.mxu0 %v4445_v37 }
 0xa5b   :  { %5940 = vmatpush3.msra.mxu0 %v4445_v37  ;;  %4473 = vmatpush1.msra.mxu1 %v4440_v42 }
 0xa5c   :  { %5941 = vmatprep.subr.mxu0 %v4442_v43  ;;  %4474 = vmatprep.subr.mxu1 %v4438_v39 }
 0xa5d   :  { %5942 = vmatpush3.msra.mxu0 %v4442_v43  ;;  %4475 = vmatpush1.msra.mxu1 %v4437_v45 }
 0xa5e   :  { %5943 = vmatprep.subr.mxu0 %v4439_v46  ;;  %4476 = vmatprep.subr.mxu1 %v4435_v47 }
 0xa5f   :  { %5944 = vmatpush3.msra.mxu0 %v4439_v46  ;;  %4477 = vmatpush1.msra.mxu1 %v4434_v44 }
 0xa60   :  { %5945 = vmatprep.subr.mxu0 %v4436_v48  ;;  %4478 = vmatprep.subr.mxu1 %v4432_v49 }
 0xa61   :  { %5946 = vmatpush3.msra.mxu0 %v4436_v48  ;;  %4479 = vmatpush1.msra.mxu1 %v4431_v50 }
 0xa62   :  { %5947 = vmatprep.subr.mxu0 %v4433_v51  ;;  %4480 = vmatprep.subr.mxu1 %v4429_v52 }
 0xa63   :  { %5948 = vmatpush3.msra.mxu0 %v4433_v51  ;;  %4481 = vmatpush1.msra.mxu1 %v4428_v53 }
 0xa64   :  { %5949 = vmatprep.subr.mxu0 %v4430_v54  ;;  %4482 = vmatprep.subr.mxu1 %v4426_v55 }
 0xa65   :  { %5950 = vmatpush3.msra.mxu0 %v4430_v54  ;;  %4483 = vmatpush1.msra.mxu1 %v4425_v56 }
 0xa66   :  { %5951 = vmatprep.subr.mxu0 %v4427_v57 }
 0xa67   :  { %5952 = vmatpush3.msra.mxu0 %v4427_v57 }
 0xb12   :  { %v4248_v59 = vpop.f32.mrf.mxu0 }
 0xb13   :  { %v4334_v60 = vadd.f32 %v4248_v59, %v7010_v24  ;;  %v5927_v2 = vpop.f32.mrf.mxu1 }
 0xb14   :  { %v4250_v62 = vpop.f32.mrf.mxu0  ;;  %v4339_v22 = vadd.f32 %v5927_v2, %v7013_v5 }
 0xb15   :  { %v4335_v63 = vadd.f32 %v4250_v62, %v7016_v27  ;;  %v4325_v21 = vpop.f32.mrf.mxu1 }
 0xb16   :  { %v4254_v10 = vpop.f32.mrf.mxu0  ;;  %v4336_v25 = vadd.f32 %v4325_v21, %v4066_v41 }
 0xb17   :  { %v4337_v12 = vadd.f32 %v4254_v10, %v7019_v28 }
 0xb18   :  { %v4256_v13 = vpop.f32.mrf.mxu0 }
 0xb19   :  { %v4338_v14 = vadd.f32 %v4256_v13, %v7022_v30 }
 0xb1a   :  { %v5938_v15 = vpop.f32.mrf.mxu0 }
 0xb1c   :  { %v4415_v16 = vpop.f32.mrf.mxu0 }
 0xb1d   :  { %4903 = vmatmul.mubr.msk.f32.vlgmr.msra.gmra.mxu1 %vm1979_vm2, %v4415_v16  ;;  %5953 = vmatprep.mubr.msk.f32.mxu0 %vm1979_vm2, %v4415_v16 }
 0xb1e   :  { %5954 = vmatmul.mubr.msk.f32.vlgmr.msra.gmra.mxu0 %vm1979_vm2, %v5938_v15  ;;  %4522 = vmatprep.mubr.f32.mxu1 %v6011_v32  ;;  %v4618_v32 = vsub.s32 1, %v6712_v8 }
 0xb20   :  { %v4619_v24 = vrot.slane %v4610_v7, %v4618_v32 }
 0xb21   :  { %4904 = vmatmul.mubr.msk.f32.gmra.mxu1 %vm1979_vm2, %v5938_v15 }
 0xbdd   :  { %v4518_v61 = vpop.f32.mrf.mxu1 }
 0xbde   :  { %v4604_v23 = vadd.f32 %v4518_v61, %v4334_v60  ;;  %v5955_v38 = vpop.f32.mrf.mxu0 }
 0xbdf   :  { %v4609_v26 = vadd.f32 %v5955_v38, %v4339_v22  ;;  %v4520_v27 = vpop.f32.mrf.mxu1 }
 0xbe0   :  { %v4627_v6 = vadd.f32 %v4615_v11, %v4604_v23  ;;  %v4605_v28 = vadd.f32 %v4520_v27, %v4335_v63  ;;  %v4595_v29 = vpop.f32.mrf.mxu0 }
 0xbe1   :  { %v4632_v8 = vadd.f32 %v4623_v3, %v4609_v26  ;;  %v4606_v30 = vadd.f32 %v4595_v29, %v4336_v25  ;;  %v4524_v4 = vpop.f32.mrf.mxu1 }
 0xbe2   :  { %4633 = vst [vmem:[#allocation5] sm:$0xff] %v4627_v6  ;;  %v4628_v31 = vadd.f32 %v4619_v24, %v4605_v28  ;;  %v4607_v9 = vadd.f32 %v4524_v4, %v4337_v12 }
 0xbe3   :  { %4638 = vst [vmem:[#allocation5 + $0x28] sm:$0xf] %v4632_v8  ;;  %v4629_v33 = vadd.f32 %v4623_v3, %v4606_v30  ;;  %v4526_v5 = vpop.f32.mrf.mxu1 }
 0xbe4   :  { %4634 = vst [vmem:[#allocation5 + $0x8] sm:$0xff] %v4628_v31  ;;  %v4630_v34 = vadd.f32 %v4615_v11, %v4607_v9  ;;  %v4608_v35 = vadd.f32 %v4526_v5, %v4338_v14 }
 0xbe5   :  { %4635 = vst [vmem:[#allocation5 + $0x10] sm:$0xff] %v4629_v33 }
 0xbe6   :  { %4636 = vst [vmem:[#allocation5 + $0x18] sm:$0xf] %v4630_v34  ;;  %v4631_v36 = vadd.f32 %v4619_v24, %v4608_v35 }
 0xbe8   :  { %4637 = vst [vmem:[#allocation5 + $0x20] sm:$0xf] %v4631_v36 }
 0xbe9   :  { %5995 = shalt.err (!%p5992_p9)
}
 0xbea   :  { %4650 = dma.vmem_to_hbm [thread:$0]  %s4645_s30, 768, %s7084_s10, [#allocation4], %s6009_s16, %s6009_s16, %s6010_s17  }
 0xbeb   :  { %6006 = dma.done.wait [#allocation4], 768  }
 0xbec   :  { %6007 = vsyncadd [#allocation4], 4294966528 }
 0xbed   :  { %4654 = vsyncpa [#allocation3], 1 }
 0xbee   :  { %4655 = vsyncpa [#allocation4], 1 }

</bundles_post_ra>
